<compile_context>
chip_gen: v7x
topology: tpu7x:2x2x1
jax: 0.10.0
libtpu: 0.0.40
codegen_flags: <defaults>
</compile_context>

<pallas_src>
import functools
import math

import jax
import jax.numpy as jnp
from jax import lax
from jax.experimental import pallas as pl
from jax.experimental.pallas import tpu as pltpu


def _mha_kernel(q_ref, k_ref, v_ref, bias_ref,
                wq_ref, bq_ref, wk_ref, bk_ref, wv_ref, bv_ref,
                wo_ref, bo_ref, o_ref, *, seq_len, n_heads, d_k, zero_pad):
    BS, D = q_ref.shape                  # (B_TILE * S, D)
    S = seq_len
    B = BS // S
    H, dk = n_heads, d_k
    mm = jnp.bfloat16                    # MXU-native operand dtype; f32 accumulation

    # ---- Lane-dense projections on the MXU: (B*S, D) @ (D, D), bf16 x bf16 -> f32.
    # 1/sqrt(d_k) is already folded into wq/bq by the wrapper; weights arrive bf16.
    qp = jnp.dot(q_ref[...].astype(mm), wq_ref[...],
                 preferred_element_type=jnp.float32) + bq_ref[...]
    kp = jnp.dot(k_ref[...].astype(mm), wk_ref[...],
                 preferred_element_type=jnp.float32) + bk_ref[...]
    vp = jnp.dot(v_ref[...].astype(mm), wv_ref[...],
                 preferred_element_type=jnp.float32) + bv_ref[...]

    def split_heads(x):
        # (B*S, H*dk) -> (B*H, S, dk): heads become an explicit batch dim.
        # Done on bf16 data so the relayout moves half the bytes.
        return x.reshape(B, S, H, dk).transpose(0, 2, 1, 3).reshape(B * H, S, dk)

    qh = split_heads(qp.astype(mm))
    kh = split_heads(kp.astype(mm))
    vh = split_heads(vp.astype(mm))

    # scores[b, i, j] = sum_f qh[b, i, f] * kh[b, j, f]   -> (B*H, S, S), f32 acc.
    scores = lax.dot_general(qh, kh, (((2,), (2,)), ((0,), (0,))),
                             preferred_element_type=jnp.float32)
    scores = scores + bias_ref[...]       # additive mask: 0 valid / -1e30 masked (f32)

    # Numerically-stable softmax in f32; reciprocal goes to the EUP slot.
    # (A fully-masked row would give uniform 1/S attention rather than NaN; this
    #  cannot happen with SAKT's lower-triangular mask.)
    m = jnp.max(scores, axis=-1, keepdims=True)
    p = jnp.exp(scores - m)
    attn = p * pl.reciprocal(jnp.sum(p, axis=-1, keepdims=True), approx=True)

    # ctx[b, i, f] = sum_j attn[b, i, j] * vh[b, j, f]    -> (B*H, S, dk), f32 acc.
    ctx = lax.dot_general(attn.astype(mm), vh, (((2,), (1,)), ((0,), (0,))),
                          preferred_element_type=jnp.float32)

    if zero_pad:
        # torch: scores = cat([zeros(bs, h, 1, S), scores[:, :, 1:, :]], dim=2)
        # Zeroing attn's query-row 0 before the V matmul is identical to zeroing
        # ctx's query-row 0 after it — and is S/dk times less select work.
        qidx = lax.broadcasted_iota(jnp.int32, ctx.shape, 1)
        ctx = jnp.where(qidx == 0, jnp.float32(0.0), ctx)

    # ---- Concat heads (bf16 relayout) + lane-dense output projection. ----
    concat = ctx.astype(mm).reshape(B, H, S, dk).transpose(0, 2, 1, 3).reshape(BS, D)
    out = jnp.dot(concat, wo_ref[...], preferred_element_type=jnp.float32) + bo_ref[...]

    o_ref[...] = out.astype(o_ref.dtype)


def _vmem_capacity_bytes():
    """Physical VMEM of the current chip (64 MiB v7x, 128 MiB v5e/v6e)."""
    try:
        cap = getattr(pltpu.get_tpu_info(), "vmem_capacity_bytes", None)
        if cap:
            return int(cap)
    except Exception:
        pass
    return 64 * 1024 * 1024   # conservative default (v7x per-TC)


def _vmem_bytes_estimate(b_tile, S, D, H):
    """Rough per-step VMEM footprint: pipelined blocks + materialized intermediates."""
    f32, bf16 = 4, 2
    rows = b_tile * S
    act = 3 * 2 * rows * D * f32                    # q,k,v blocks, double-buffered
    outb = 2 * rows * D * f32                       # output block, double-buffered
    wts = 2 * (4 * D * D * bf16 + 4 * D * f32 + S * S * f32)   # weights/bias/mask
    inter = (3 * rows * D * f32                     # qp/kp/vp (f32)
             + 3 * rows * D * bf16                  # qh/kh/vh (bf16)
             + 2 * b_tile * H * S * S * f32         # scores + attn (f32)
             + rows * D * (f32 + bf16)              # ctx + concat
             + rows * D * f32)                      # out
    return act + outb + wts + inter


def _pick_b_tile(bs, S, D, H, vmem_cap):
    """Largest batch tile that (a) keeps >= 2 grid steps when bs >= 2 so both
    v7x TensorCores get work, (b) keeps blocks sublane-aligned, and (c) fits
    the VMEM budget with headroom."""
    divisors = [d for d in range(bs, 0, -1) if bs % d == 0]

    def aligned(t):
        return (t * S) % 8 == 0 or t == bs          # (8,128) second-to-last-dim rule

    cands = [t for t in divisors if bs // t >= 2 and aligned(t)]
    if not cands:
        cands = [t for t in divisors if aligned(t)] or divisors
    for t in cands:
        if _vmem_bytes_estimate(t, S, D, H) <= vmem_cap // 2:
            return t
    return cands[-1]


def multi_head_attention(q, k, v, mask, params, *, n_heads, zero_pad, kq_same):
    """q, k, v: (bs, S, d_model); mask: (S, S).  Returns (bs, S, d_model)."""
    bs, S, D = q.shape
    H = n_heads
    dk = D // H

    vmem_cap = _vmem_capacity_bytes()
    b_tile = _pick_b_tile(bs, S, D, H, vmem_cap)
    grid = (bs // b_tile,)

    # Explicit scoped-VMEM limit sized from the actual footprint, with headroom,
    # capped below the chip's physical VMEM (matters on v7x's 64 MiB).
    budget = _vmem_bytes_estimate(b_tile, S, D, H)
    vmem_limit = int(min(0.75 * vmem_cap, max(32 * 1024 * 1024, 2 * budget)))

    # PyTorch Linear: y = x @ W.T + b with W stored (out, in) -> pass W.T (in, out).
    # Weights pre-cast to bf16 (MXU operands); biases stay f32.
    wq_src, bq_src = (params['wk'], params['bk']) if kq_same else (params['wq'], params['bq'])
    scale = 1.0 / math.sqrt(dk)
    wq_t = (wq_src.T * scale).astype(jnp.bfloat16)           # scale folded into Q proj
    bq_s = (bq_src * scale).reshape(1, D).astype(jnp.float32)
    wk_t = params['wk'].T.astype(jnp.bfloat16)
    bk_s = params['bk'].reshape(1, D).astype(jnp.float32)
    wv_t = params['wv'].T.astype(jnp.bfloat16)
    bv_s = params['bv'].reshape(1, D).astype(jnp.float32)
    wo_t = params['wo'].T.astype(jnp.bfloat16)
    bo_s = params['bo'].reshape(1, D).astype(jnp.float32)

    # Additive mask bias: 0 where attended, -1e30 where masked (no -inf NaN hazard).
    bias = jnp.where(mask == 0, jnp.float32(-1e30), jnp.float32(0.0))

    # Flatten (bs, S, D) -> (bs*S, D) on the wrapper side (free) so kernel
    # loads/stores are plain 2-D sublane/lane-dense slabs.
    q2 = q.reshape(bs * S, D)
    k2 = k.reshape(bs * S, D)
    v2 = v.reshape(bs * S, D)

    kernel = functools.partial(_mha_kernel, seq_len=S, n_heads=H, d_k=dk,
                               zero_pad=zero_pad)

    act_spec = pl.BlockSpec((b_tile * S, D), lambda b: (b, 0))
    const2d = lambda b: (0, 0)   # constant index_map: fetched once, revisited

    out_flat = pl.pallas_call(
        kernel,
        out_shape=jax.ShapeDtypeStruct((bs * S, D), q.dtype),
        grid_spec=pltpu.PrefetchScalarGridSpec(
            num_scalar_prefetch=0,
            grid=grid,
            in_specs=[
                act_spec,                               # q (flattened)
                act_spec,                               # k
                act_spec,                               # v
                pl.BlockSpec((S, S), const2d),          # additive mask bias (f32)
                pl.BlockSpec((D, D), const2d),          # wq^T (pre-scaled, bf16)
                pl.BlockSpec((1, D), const2d),          # bq (pre-scaled, f32)
                pl.BlockSpec((D, D), const2d),          # wk^T (bf16)
                pl.BlockSpec((1, D), const2d),          # bk
                pl.BlockSpec((D, D), const2d),          # wv^T (bf16)
                pl.BlockSpec((1, D), const2d),          # bv
                pl.BlockSpec((D, D), const2d),          # wo^T (bf16)
                pl.BlockSpec((1, D), const2d),          # bo
            ],
            out_specs=pl.BlockSpec((b_tile * S, D), lambda b: (b, 0)),
        ),
        compiler_params=pltpu.CompilerParams(
            dimension_semantics=("parallel",),
            vmem_limit_bytes=vmem_limit),
    )(q2, k2, v2, bias, wq_t, bq_s, wk_t, bk_s, wv_t, bv_s, wo_t, bo_s)

    return out_flat.reshape(bs, S, D)


def _reference(q, k, v, mask, params, *, n_heads, zero_pad, kq_same):
    """Pure-JAX f32 replica of the PyTorch forward (eval mode) for validation."""
    bs, S, D = q.shape
    dk = D // n_heads

    def lin(x, w, b):
        return x @ w.T + b

    wq, bq = (params['wk'], params['bk']) if kq_same else (params['wq'], params['bq'])
    kp = lin(k, params['wk'], params['bk']).reshape(bs, S, n_heads, dk).transpose(0, 2, 1, 3)
    qp = lin(q, wq, bq).reshape(bs, S, n_heads, dk).transpose(0, 2, 1, 3)
    vp = lin(v, params['wv'], params['bv']).reshape(bs, S, n_heads, dk).transpose(0, 2, 1, 3)

    scores = jnp.einsum('bhqf,bhkf->bhqk', qp, kp) / (dk ** 0.5)
    scores = jnp.where(mask[None, None] == 0, -jnp.inf, scores)
    scores = jax.nn.softmax(scores, axis=-1)
    if zero_pad:
        scores = scores.at[:, :, 0, :].set(0.0)
    out = jnp.einsum('bhqk,bhkf->bhqf', scores, vp)
    concat = out.transpose(0, 2, 1, 3).reshape(bs, S, D)
    return lin(concat, params['wo'], params['bo'])


if __name__ == "__main__":
    # Small, forward-consistent shapes.
    bs, S, d_model, n_heads = 2, 8, 32, 4
    kq_same = False
    zero_pad = True

    key = jax.random.PRNGKey(0)
    keys = jax.random.split(key, 12)

    def init_linear(kw, kb):
        w = jax.random.normal(kw, (d_model, d_model), jnp.float32) * 0.1  # (out, in)
        b = jax.random.normal(kb, (d_model,), jnp.float32) * 0.1
        return w, b

    wq, bq = init_linear(keys[0], keys[1])
    wk, bk = init_linear(keys[2], keys[3])
    wv, bv = init_linear(keys[4], keys[5])
    wo, bo = init_linear(keys[6], keys[7])
    params = dict(wq=wq, bq=bq, wk=wk, bk=bk, wv=wv, bv=bv, wo=wo, bo=bo)

    q = jax.random.normal(keys[8], (bs, S, d_model), jnp.float32)
    k = jax.random.normal(keys[9], (bs, S, d_model), jnp.float32)
    v = jax.random.normal(keys[10], (bs, S, d_model), jnp.float32)
    # Causal (lower-triangular) mask, as used by SAKT.
    mask = jnp.tril(jnp.ones((S, S), jnp.float32))

    out = multi_head_attention(q, k, v, mask, params,
                               n_heads=n_heads, zero_pad=zero_pad, kq_same=kq_same)
    out = jax.block_until_ready(out)

    ref = _reference(q, k, v, mask, params,
                     n_heads=n_heads, zero_pad=zero_pad, kq_same=kq_same)
    assert out.shape == (bs, S, d_model)
    # Tolerance accounts for bf16 MXU operands (f32 accumulation) and the EUP
    # approximate reciprocal in the softmax vs. the pure-f32 reference.
    assert jnp.allclose(out, ref, atol=3e-2, rtol=3e-2), "mismatch vs JAX reference"

    print("KERNEL_OK")
</pallas_src>

<mosaic_0001>
module attributes {stable_mosaic.version = 11 : i64} {
  func.func @_mha_kernel(%arg0: i32, %arg1: memref<8x32xf32, #tpu.memory_space<vmem>>, %arg2: memref<8x32xf32, #tpu.memory_space<vmem>>, %arg3: memref<8x32xf32, #tpu.memory_space<vmem>>, %arg4: memref<8x8xf32, #tpu.memory_space<vmem>>, %arg5: memref<32x32xbf16, #tpu.memory_space<vmem>>, %arg6: memref<1x32xf32, #tpu.memory_space<vmem>>, %arg7: memref<32x32xbf16, #tpu.memory_space<vmem>>, %arg8: memref<1x32xf32, #tpu.memory_space<vmem>>, %arg9: memref<32x32xbf16, #tpu.memory_space<vmem>>, %arg10: memref<1x32xf32, #tpu.memory_space<vmem>>, %arg11: memref<32x32xbf16, #tpu.memory_space<vmem>>, %arg12: memref<1x32xf32, #tpu.memory_space<vmem>>, %arg13: memref<8x32xf32, #tpu.memory_space<vmem>>) attributes {dimension_semantics = [#tpu.dimension_semantics<parallel>], iteration_bounds = array<i64: 2>, scalar_prefetch = 0 : i64, scratch_operands = 0 : i64, tpu.core_type = #tpu.core_type<tc>, window_params = [{transform_indices = @transform_0, window_bounds = array<i64: 8, 32>}, {transform_indices = @transform_1, window_bounds = array<i64: 8, 32>}, {transform_indices = @transform_2, window_bounds = array<i64: 8, 32>}, {pipeline_mode = #tpu.pipeline_mode<synchronous>, transform_indices = @transform_3, window_bounds = array<i64: 8, 8>}, {pipeline_mode = #tpu.pipeline_mode<synchronous>, transform_indices = @transform_4, window_bounds = array<i64: 32, 32>}, {pipeline_mode = #tpu.pipeline_mode<synchronous>, transform_indices = @transform_5, window_bounds = array<i64: 1, 32>}, {pipeline_mode = #tpu.pipeline_mode<synchronous>, transform_indices = @transform_6, window_bounds = array<i64: 32, 32>}, {pipeline_mode = #tpu.pipeline_mode<synchronous>, transform_indices = @transform_7, window_bounds = array<i64: 1, 32>}, {pipeline_mode = #tpu.pipeline_mode<synchronous>, transform_indices = @transform_8, window_bounds = array<i64: 32, 32>}, {pipeline_mode = #tpu.pipeline_mode<synchronous>, transform_indices = @transform_9, window_bounds = array<i64: 1, 32>}, {pipeline_mode = #tpu.pipeline_mode<synchronous>, transform_indices = @transform_10, window_bounds = array<i64: 32, 32>}, {pipeline_mode = #tpu.pipeline_mode<synchronous>, transform_indices = @transform_11, window_bounds = array<i64: 1, 32>}, {transform_indices = @transform_12, window_bounds = array<i64: 8, 32>}]} {
    %c0 = arith.constant 0 : index
    %c0_0 = arith.constant 0 : index
    %0 = vector.load %arg1[%c0, %c0_0] : memref<8x32xf32, #tpu.memory_space<vmem>>, vector<8x32xf32>
    %1 = arith.truncf %0 : vector<8x32xf32> to vector<8x32xbf16>
    %c0_1 = arith.constant 0 : index
    %c0_2 = arith.constant 0 : index
    %2 = vector.load %arg5[%c0_1, %c0_2] : memref<32x32xbf16, #tpu.memory_space<vmem>>, vector<32x32xbf16>
    %cst = arith.constant dense<0.000000e+00> : vector<8x32xf32>
    %3 = tpu.matmul %1, %2, %cst {dimension_numbers = #tpu.dot_dimension_numbers<[1], [0], [0], [1], [0, 0, 1, 1], [], []>} : vector<8x32xbf16>, vector<32x32xbf16>, vector<8x32xf32> -> vector<8x32xf32>
    %c0_3 = arith.constant 0 : index
    %c0_4 = arith.constant 0 : index
    %4 = vector.load %arg6[%c0_3, %c0_4] : memref<1x32xf32, #tpu.memory_space<vmem>>, vector<1x32xf32>
    %5 = vector.broadcast %4 : vector<1x32xf32> to vector<8x32xf32>
    %6 = arith.addf %3, %5 : vector<8x32xf32>
    %c0_5 = arith.constant 0 : index
    %c0_6 = arith.constant 0 : index
    %7 = vector.load %arg2[%c0_5, %c0_6] : memref<8x32xf32, #tpu.memory_space<vmem>>, vector<8x32xf32>
    %8 = arith.truncf %7 : vector<8x32xf32> to vector<8x32xbf16>
    %c0_7 = arith.constant 0 : index
    %c0_8 = arith.constant 0 : index
    %9 = vector.load %arg7[%c0_7, %c0_8] : memref<32x32xbf16, #tpu.memory_space<vmem>>, vector<32x32xbf16>
    %cst_9 = arith.constant dense<0.000000e+00> : vector<8x32xf32>
    %10 = tpu.matmul %8, %9, %cst_9 {dimension_numbers = #tpu.dot_dimension_numbers<[1], [0], [0], [1], [0, 0, 1, 1], [], []>} : vector<8x32xbf16>, vector<32x32xbf16>, vector<8x32xf32> -> vector<8x32xf32>
    %c0_10 = arith.constant 0 : index
    %c0_11 = arith.constant 0 : index
    %11 = vector.load %arg8[%c0_10, %c0_11] : memref<1x32xf32, #tpu.memory_space<vmem>>, vector<1x32xf32>
    %12 = vector.broadcast %11 : vector<1x32xf32> to vector<8x32xf32>
    %13 = arith.addf %10, %12 : vector<8x32xf32>
    %c0_12 = arith.constant 0 : index
    %c0_13 = arith.constant 0 : index
    %14 = vector.load %arg3[%c0_12, %c0_13] : memref<8x32xf32, #tpu.memory_space<vmem>>, vector<8x32xf32>
    %15 = arith.truncf %14 : vector<8x32xf32> to vector<8x32xbf16>
    %c0_14 = arith.constant 0 : index
    %c0_15 = arith.constant 0 : index
    %16 = vector.load %arg9[%c0_14, %c0_15] : memref<32x32xbf16, #tpu.memory_space<vmem>>, vector<32x32xbf16>
    %cst_16 = arith.constant dense<0.000000e+00> : vector<8x32xf32>
    %17 = tpu.matmul %15, %16, %cst_16 {dimension_numbers = #tpu.dot_dimension_numbers<[1], [0], [0], [1], [0, 0, 1, 1], [], []>} : vector<8x32xbf16>, vector<32x32xbf16>, vector<8x32xf32> -> vector<8x32xf32>
    %c0_17 = arith.constant 0 : index
    %c0_18 = arith.constant 0 : index
    %18 = vector.load %arg10[%c0_17, %c0_18] : memref<1x32xf32, #tpu.memory_space<vmem>>, vector<1x32xf32>
    %19 = vector.broadcast %18 : vector<1x32xf32> to vector<8x32xf32>
    %20 = arith.addf %17, %19 : vector<8x32xf32>
    %21 = arith.truncf %6 : vector<8x32xf32> to vector<8x32xbf16>
    %22 = vector.shape_cast %21 : vector<8x32xbf16> to vector<1x8x4x8xbf16>
    %23 = tpu.transpose %22, [0, 2, 1, 3] : vector<1x8x4x8xbf16> -> vector<1x4x8x8xbf16>
    %24 = vector.shape_cast %23 : vector<1x4x8x8xbf16> to vector<4x8x8xbf16>
    %25 = arith.truncf %13 : vector<8x32xf32> to vector<8x32xbf16>
    %26 = vector.shape_cast %25 : vector<8x32xbf16> to vector<1x8x4x8xbf16>
    %27 = tpu.transpose %26, [0, 2, 1, 3] : vector<1x8x4x8xbf16> -> vector<1x4x8x8xbf16>
    %28 = vector.shape_cast %27 : vector<1x4x8x8xbf16> to vector<4x8x8xbf16>
    %29 = arith.truncf %20 : vector<8x32xf32> to vector<8x32xbf16>
    %30 = vector.shape_cast %29 : vector<8x32xbf16> to vector<1x8x4x8xbf16>
    %31 = tpu.transpose %30, [0, 2, 1, 3] : vector<1x8x4x8xbf16> -> vector<1x4x8x8xbf16>
    %32 = vector.shape_cast %31 : vector<1x4x8x8xbf16> to vector<4x8x8xbf16>
    %cst_19 = arith.constant dense<0.000000e+00> : vector<4x8x8xf32>
    %33 = tpu.matmul %24, %28, %cst_19 {dimension_numbers = #tpu.dot_dimension_numbers<[2], [2], [1], [1], [0, 0, 0, 1, 1, 1], [0], [0]>} : vector<4x8x8xbf16>, vector<4x8x8xbf16>, vector<4x8x8xf32> -> vector<4x8x8xf32>
    %c0_20 = arith.constant 0 : index
    %c0_21 = arith.constant 0 : index
    %34 = vector.load %arg4[%c0_20, %c0_21] : memref<8x8xf32, #tpu.memory_space<vmem>>, vector<8x8xf32>
    %35 = vector.shape_cast %34 : vector<8x8xf32> to vector<1x8x8xf32>
    %36 = vector.broadcast %35 : vector<1x8x8xf32> to vector<4x8x8xf32>
    %37 = arith.addf %33, %36 : vector<4x8x8xf32>
    %cst_22 = arith.constant dense<0xFF800000> : vector<4x8xf32>
    %38 = vector.multi_reduction <maximumf>, %37, %cst_22 [2] : vector<4x8x8xf32> to vector<4x8xf32>
    %39 = vector.shape_cast %38 : vector<4x8xf32> to vector<4x8x1xf32>
    %40 = vector.broadcast %39 : vector<4x8x1xf32> to vector<4x8x8xf32>
    %41 = arith.subf %37, %40 : vector<4x8x8xf32>
    %42 = math.exp %41 : vector<4x8x8xf32>
    %cst_23 = arith.constant dense<0.000000e+00> : vector<4x8xf32>
    %43 = vector.multi_reduction <add>, %42, %cst_23 [2] : vector<4x8x8xf32> to vector<4x8xf32>
    %44 = vector.shape_cast %43 : vector<4x8xf32> to vector<4x8x1xf32>
    %45 = tpu.reciprocal %44 {approx = true} : vector<4x8x1xf32> -> vector<4x8x1xf32>
    %46 = vector.broadcast %45 : vector<4x8x1xf32> to vector<4x8x8xf32>
    %47 = arith.mulf %42, %46 : vector<4x8x8xf32>
    %48 = arith.truncf %47 : vector<4x8x8xf32> to vector<4x8x8xbf16>
    %cst_24 = arith.constant dense<0.000000e+00> : vector<4x8x8xf32>
    %49 = tpu.matmul %48, %32, %cst_24 {dimension_numbers = #tpu.dot_dimension_numbers<[2], [1], [1], [2], [0, 0, 0, 1, 1, 2], [0], [0]>} : vector<4x8x8xbf16>, vector<4x8x8xbf16>, vector<4x8x8xf32> -> vector<4x8x8xf32>
    %50 = tpu.iota {dimensions = array<i32: 1>} : vector<4x8x8xi32>
    %c0_i32 = arith.constant 0 : i32
    %51 = vector.broadcast %c0_i32 : i32 to vector<4x8x8xi32>
    %52 = arith.cmpi eq, %50, %51 : vector<4x8x8xi32>
    %cst_25 = arith.constant 0.000000e+00 : f32
    %53 = vector.broadcast %cst_25 : f32 to vector<4x8x8xf32>
    %54 = arith.select %52, %53, %49 : vector<4x8x8xi1>, vector<4x8x8xf32>
    %55 = arith.truncf %54 : vector<4x8x8xf32> to vector<4x8x8xbf16>
    %56 = vector.shape_cast %55 : vector<4x8x8xbf16> to vector<1x4x8x8xbf16>
    %57 = tpu.transpose %56, [0, 2, 1, 3] : vector<1x4x8x8xbf16> -> vector<1x8x4x8xbf16>
    %58 = vector.shape_cast %57 : vector<1x8x4x8xbf16> to vector<8x32xbf16>
    %c0_26 = arith.constant 0 : index
    %c0_27 = arith.constant 0 : index
    %59 = vector.load %arg11[%c0_26, %c0_27] : memref<32x32xbf16, #tpu.memory_space<vmem>>, vector<32x32xbf16>
    %cst_28 = arith.constant dense<0.000000e+00> : vector<8x32xf32>
    %60 = tpu.matmul %58, %59, %cst_28 {dimension_numbers = #tpu.dot_dimension_numbers<[1], [0], [0], [1], [0, 0, 1, 1], [], []>} : vector<8x32xbf16>, vector<32x32xbf16>, vector<8x32xf32> -> vector<8x32xf32>
    %c0_29 = arith.constant 0 : index
    %c0_30 = arith.constant 0 : index
    %61 = vector.load %arg12[%c0_29, %c0_30] : memref<1x32xf32, #tpu.memory_space<vmem>>, vector<1x32xf32>
    %62 = vector.broadcast %61 : vector<1x32xf32> to vector<8x32xf32>
    %63 = arith.addf %60, %62 : vector<8x32xf32>
    %c0_31 = arith.constant 0 : index
    %c0_32 = arith.constant 0 : index
    %64 = vector.load %arg13[%c0_31, %c0_32] : memref<8x32xf32, #tpu.memory_space<vmem>>, vector<8x32xf32>
    tpu.vector_store %arg13[%c0_31, %c0_32], %63 {strides = array<i32>} : memref<8x32xf32, #tpu.memory_space<vmem>>, vector<8x32xf32>,
    return
  }
  func.func @transform_0(%arg0: i32) -> (i32, i32) {
    %c0_i32 = arith.constant 0 : i32
    %c0_i32_0 = arith.constant 0 : i32
    return %arg0, %c0_i32 : i32, i32
  }
  func.func @transform_1(%arg0: i32) -> (i32, i32) {
    %c0_i32 = arith.constant 0 : i32
    %c0_i32_0 = arith.constant 0 : i32
    return %arg0, %c0_i32 : i32, i32
  }
  func.func @transform_2(%arg0: i32) -> (i32, i32) {
    %c0_i32 = arith.constant 0 : i32
    %c0_i32_0 = arith.constant 0 : i32
    return %arg0, %c0_i32 : i32, i32
  }
  func.func @transform_3(%arg0: i32) -> (i32, i32) {
    %c0_i32 = arith.constant 0 : i32
    %c0_i32_0 = arith.constant 0 : i32
    %c0_i32_1 = arith.constant 0 : i32
    return %c0_i32, %c0_i32_0 : i32, i32
  }
  func.func @transform_4(%arg0: i32) -> (i32, i32) {
    %c0_i32 = arith.constant 0 : i32
    %c0_i32_0 = arith.constant 0 : i32
    %c0_i32_1 = arith.constant 0 : i32
    return %c0_i32, %c0_i32_0 : i32, i32
  }
  func.func @transform_5(%arg0: i32) -> (i32, i32) {
    %c0_i32 = arith.constant 0 : i32
    %c0_i32_0 = arith.constant 0 : i32
    %c0_i32_1 = arith.constant 0 : i32
    return %c0_i32, %c0_i32_0 : i32, i32
  }
  func.func @transform_6(%arg0: i32) -> (i32, i32) {
    %c0_i32 = arith.constant 0 : i32
    %c0_i32_0 = arith.constant 0 : i32
    %c0_i32_1 = arith.constant 0 : i32
    return %c0_i32, %c0_i32_0 : i32, i32
  }
  func.func @transform_7(%arg0: i32) -> (i32, i32) {
    %c0_i32 = arith.constant 0 : i32
    %c0_i32_0 = arith.constant 0 : i32
    %c0_i32_1 = arith.constant 0 : i32
    return %c0_i32, %c0_i32_0 : i32, i32
  }
  func.func @transform_8(%arg0: i32) -> (i32, i32) {
    %c0_i32 = arith.constant 0 : i32
    %c0_i32_0 = arith.constant 0 : i32
    %c0_i32_1 = arith.constant 0 : i32
    return %c0_i32, %c0_i32_0 : i32, i32
  }
  func.func @transform_9(%arg0: i32) -> (i32, i32) {
    %c0_i32 = arith.constant 0 : i32
    %c0_i32_0 = arith.constant 0 : i32
    %c0_i32_1 = arith.constant 0 : i32
    return %c0_i32, %c0_i32_0 : i32, i32
  }
  func.func @transform_10(%arg0: i32) -> (i32, i32) {
    %c0_i32 = arith.constant 0 : i32
    %c0_i32_0 = arith.constant 0 : i32
    %c0_i32_1 = arith.constant 0 : i32
    return %c0_i32, %c0_i32_0 : i32, i32
  }
  func.func @transform_11(%arg0: i32) -> (i32, i32) {
    %c0_i32 = arith.constant 0 : i32
    %c0_i32_0 = arith.constant 0 : i32
    %c0_i32_1 = arith.constant 0 : i32
    return %c0_i32, %c0_i32_0 : i32, i32
  }
  func.func @transform_12(%arg0: i32) -> (i32, i32) {
    %c0_i32 = arith.constant 0 : i32
    %c0_i32_0 = arith.constant 0 : i32
    return %arg0, %c0_i32 : i32, i32
  }
}

</mosaic_0001>

<bundles_post_ra>
// kernel: tpu_custom_call.1
= control target key start
LH: loop header
LB: loop body
LE: loop exit
PB: predicated region body
PF: predicated region fallthrough
CT: control target
= control target key end

     0   :  { %s3313_s0 = inlined_call_operand.hbm [shape: f32[16,32], index: 0, kind: input, shape index: {}]   ;;  %s3314_s1 = inlined_call_operand.hbm [shape: f32[16,32], index: 1, kind: input, shape index: {}]   ;;  %s3315_s2 = inlined_call_operand.hbm [shape: f32[16,32], index: 2, kind: input, shape index: {}]   ;;  %s3316_s3 = inlined_call_operand.hbm [shape: f32[8,8], index: 3, kind: input, shape index: {}]   ;;  %s3317_s4 = inlined_call_operand.hbm [shape: bf16[32,32], index: 4, kind: input, shape index: {}]   ;;  %s3318_s5 = inlined_call_operand.vmem [shape: f32[1,32], index: 5, kind: input, shape index: {}]   ;;  %s3319_s6 = inlined_call_operand.vmem [shape: bf16[32,32], index: 6, kind: input, shape index: {}]   ;;  %s3320_s7 = inlined_call_operand.vmem [shape: f32[1,32], index: 7, kind: input, shape index: {}]   ;;  %s3321_s8 = inlined_call_operand.hbm [shape: bf16[32,32], index: 8, kind: input, shape index: {}]   ;;  %s3322_s9 = inlined_call_operand.hbm [shape: f32[1,32], index: 9, kind: input, shape index: {}]   ;;  %s3323_s10 = inlined_call_operand.vmem [shape: bf16[32,32], index: 10, kind: input, shape index: {}]   ;;  %s3324_s11 = inlined_call_operand.vmem [shape: f32[1,32], index: 11, kind: input, shape index: {}]   ;;  %s3325_s12 = inlined_call_operand.hbm [shape: f32[16,32], index: 12, kind: output, shape index: {}]  }
   0x1   :  { %3350 = sst [smem:[#allocation26_spill]] %s3314_s1 }
   0x2   :  { %3351 = sst [smem:[#allocation27_spill]] %s3316_s3 }
   0x3   :  { %3352 = sst [smem:[#allocation28_spill]] %s3318_s5 }
   0x4   :  { %3353 = sst [smem:[#allocation29_spill]] %s3320_s7 }
   0x5   :  { %3354 = sst [smem:[#allocation30_spill]] %s3321_s8 }
   0x6   :  { %3355 = sst [smem:[#allocation31_spill]] %s3323_s10 }
   0x7   :  { %3356 = sst [smem:[#allocation32_spill]] %s3324_s11 }
   0x8   :  { %3357 = sst [smem:[#allocation33_spill]] %s3325_s12 }
   0x9   :  { %17 = vsyncpa [#allocation3], 0 }
   0xa   :  { %19 = vsyncpa [#allocation3 + $0x1], 0 }
   0xb   :  { %20 = vsyncpa [#allocation6], 0 }
   0xc   :  { %22 = vsyncpa [#allocation6 + $0x1], 0 }
   0xd   :  { %23 = vsyncpa [#allocation9], 0 }
   0xe   :  { %24 = vsyncpa [#allocation12], 0 }
   0xf   :  { %25 = vsyncpa [#allocation4], 0 }
  0x10   :  { %27 = vsyncpa [#allocation4 + $0x1], 0  ;;  %s2761_s21 = smov 0   ;;  %s2763_s22 = smov 0  }
  0x11   :  { %s2765_s23 = smov 0   ;;  %s2767_s24 = smov 0  }
  0x12 LB: > { %3358 = sst [smem:[#allocation20_spill]] %s2661_s21  ;;  %s2675_s25 = smov [#allocation8]   ;;  %s2673_s24 = sphi %s2767_s24, %s3403_s24   ;;  %s2669_s23 = sphi %s2765_s23, %s3407_s23   ;;  %s2665_s22 = sphi %s2763_s22, %s3406_s22   ;;  %s2661_s21 = sphi %s2761_s21, %s3405_s21  }
  0x13   : > { %3359 = sst [smem:[#allocation21_spill]] %s2673_s24  ;;  %s344_s26 = sshll.u32 %s2675_s25, 4  ;;  %s345_s26 = int_to_ptr.vmem [resolvable:$true] %s344_s26 }
  0x14   : > { %s2782_s27 = sadd.s32 4294967295, %s2673_s24   ;;  %p2102_p0 = scmp.ge.s32.totalorder %s2673_s24, 1 }
  0x15   : > { %p3326_p1 = scmp.eq.s32.totalorder %s2782_s27, 0  ;;  %p331_p2 = scmp.lt.s32.totalorder %s2673_s24, 3 }
  0x16   : > { %s2676_s29 = smov [#allocation11]   ;;  %s3362_s3 = sld [smem:[#allocation27_spill]] }
  0x17   : > { %p2787_p3 = pnand %p2102_p0, %p331_p2  ;;  %s376_s30 = sshll.u32 %s2676_s29, 4  ;;  %s2800_s30 = int_to_ptr.vmem [resolvable:$true] %s376_s30 }
  0x19   : > { %s3360_s28 = scalar_select %p2787_p3, 1, 0 }
  0x1a   : > { %p2283_p5 = pneg %p2787_p3 }
  0x1c   : > { %p2796_p6 = pnand %p2283_p5, %p3326_p1  ;;  %s2393_s16 = scalar_lea.hbm %s3362_s3, 128 }
  0x1d   : > { %p2394_p7 = scmp.ne.s32.totalorder %s3362_s3, %s2393_s16  ;;  %p2400_p11 = scmp.lt.u32.totalorder %s2393_s16, %s3362_s3 }
  0x1e   : > { %s3361_s13 = scalar_select %p2796_p6, 1, 0 }
  0x1f   : > { %p2810_p8 = pneg %p2796_p6 }
  0x21   : > { %s3363_s19 = scalar_select %p2810_p8, 1, 0 }
  0x22   : > { %p2396_p9 = pnand %p2810_p8, %p2394_p7 }
  0x24   : > { %p2397_p10 = pneg %p2396_p9 }
  0x26   : > { %p2402_p12 = pnand %p2400_p11, %p2397_p10 }
  0x28   : > { %2405 = shalt.err (!%p2402_p12)
}
  0x29   : > { %s2406_s29 = scalar_lea.vmem %s345_s26, 128  ;;  %p2414_p5 = scmp.lt.s32.totalorder %s345_s26, %s345_s26 }
  0x2a   : > { %p2407_p13 = scmp.ne.s32.totalorder %s345_s26, %s2406_s29  ;;  %p2415_p4 = scmp.lt.s32.totalorder %s2406_s29, %s2406_s29 }
  0x2c   : > { %p2409_p0 = pnand %p2407_p13, %p2810_p8  ;;  %p2416_p1 = por %p2415_p4, %p2414_p5 }
  0x2e   : > { %p2410_p2 = pneg %p2409_p0 }
  0x30   : > { %p2417_p3 = pnand %p2416_p1, %p2410_p2 }
  0x32   : > { %2420 = shalt.err (!%p2417_p3)
}
  0x33   : > { %2286 = dma.hbm_to_vmem [thread:$0]  (!%p2796_p6), %s3362_s3, 128, %s345_s26, [#allocation9]  }
  0x34   : > { %s3364_s8 = sld [smem:[#allocation30_spill]] }
  0x3a   : > { %s2421_s18 = scalar_lea.hbm %s3364_s8, 256 }
  0x3b   : > { %p2422_p7 = scmp.ne.s32.totalorder %s3364_s8, %s2421_s18  ;;  %p2428_p1 = scmp.lt.u32.totalorder %s2421_s18, %s3364_s8 }
  0x3d   : > { %p2424_p9 = pnand %p2422_p7, %p2810_p8 }
  0x3f   : > { %p2425_p4 = pneg %p2424_p9 }
  0x41   : > { %p2430_p3 = pnand %p2428_p1, %p2425_p4 }
  0x43   : > { %2433 = shalt.err (!%p2430_p3)
}
  0x44   : > { %s2434_s26 = scalar_lea.vmem %s2800_s30, 256  ;;  %p2442_p13 = scmp.lt.s32.totalorder %s2800_s30, %s2800_s30 }
  0x45   : > { %p2435_p10 = scmp.ne.s32.totalorder %s2800_s30, %s2434_s26  ;;  %p2443_p0 = scmp.lt.s32.totalorder %s2434_s26, %s2434_s26 }
  0x47   : > { %p2437_p11 = pnand %p2435_p10, %p2810_p8  ;;  %p2444_p2 = por %p2443_p0, %p2442_p13 }
  0x49   : > { %p2438_p12 = pneg %p2437_p11 }
  0x4b   : > { %p2445_p5 = pnand %p2444_p2, %p2438_p12 }
  0x4d   : > { %2448 = shalt.err (!%p2445_p5)
}
  0x4e   : > { %s3329_s14 = smov 64   ;;  %s3330_s12 = smov 4  }
  0x4f   : > { %2292 = dma.hbm_to_vmem [thread:$0]  (!%p2796_p6), %s3364_s8, 256, %s2800_s30, [#allocation12], %s3329_s14, %s3329_s14, %s3330_s12  }
  0x50   : > { %s2101_s17 = sadd.s32 4294967294, %s2673_s24   ;;  %s2854_s18 = sadd.s32 1, %s2673_s24  }
  0x51   : > { %3365 = sst [smem:[#allocation22_spill]] %s2854_s18  ;;  %s37_s20 = ssub.s32 %s2673_s24, %s2854_s18 }
  0x52   : > { %s40_s25 = sadd.s32 1, %s2669_s23  ;;  %p38_p7 = scmp.eq.s32.totalorder %s37_s20, 0 }
  0x53   : > { %p47_p9 = scmp.ne.s32.totalorder %s2669_s23, %s2665_s22  ;;  %p48_p4 = scmp.eq.s32.totalorder %s2673_s24, 0 }
  0x54   : > { %p53_p1 = scmp.ne.s32.totalorder %s2665_s22, %s2661_s21  ;;  %p3367_p10 = scmp.eq.s32.totalorder %s2782_s27, 0 }
  0x55   : > { %s2865_s29 = scalar_select %p38_p7, %s2669_s23, %s40_s25  }
  0x56   : > { %p49_p3 = por %p48_p4, %p47_p9  ;;  %p2869_p11 = por %p3367_p10, %p53_p1 }
  0x57   : > { %3366 = sst [smem:[#allocation23_spill]] %s2865_s29  ;;  %p318_p12 = scmp.eq.s32.totalorder %s2782_s27, 1 }
  0x58   : > { %s3368_s26 = scalar_select %p2869_p11, 1, 0 }
  0x59   : > { %p324_p13 = scmp.eq.s32.totalorder %s2101_s17, 1  ;;  %p2314_p0 = scmp.lt.s32.totalorder %s2673_s24, 2 }
  0x5a   : > { %s3331_s30 = sand.u32 1, %s2669_s23   ;;  %p2876_p2 = por %p318_p12, %p47_p9 }
  0x5b   : > { %p2880_p5 = por %p324_p13, %p53_p1  ;;  %s2886_s20 = sshll.u32 %s3331_s30, 3 }
  0x5c   : > { %s3369_s15 = scalar_select %p2876_p2, 1, 0 }
  0x5d   : > { %s3371_s16 = scalar_select %p2880_p5, 1, 0 }
  0x5e   : > { %3370 = sst [smem:[#allocation24_spill]] %s3369_s15  ;;  %s2889_s25 = sshll.u32 %s2673_s24, 7 }
  0x5f   : > { %3372 = sst [smem:[#allocation25_spill]] %s3371_s16  ;;  %p2891_p7 = pnand %p2314_p0, %p49_p3 }
  0x60   : > { %s425_s17 = sand.u32 1, %s2673_s24   ;;  %s3374_s1 = sld [smem:[#allocation26_spill]] }
  0x61   : > { %s3373_s14 = scalar_select %p2891_p7, 1, 0 }
  0x62   : > { %s429_s30 = scalar_lea.vmem [#allocation5], %s2886_s20  ;;  %s2679_s18 = smov [#allocation10]  }
  0x63   : > { %s436_s29 = sshll.u32 %s429_s30, 4  ;;  %s2905_s16 = sshll.u32 %s2679_s18, 4  ;;  %s2903_s29 = int_to_ptr.vmem [resolvable:$true] %s436_s29  ;;  %s355_s16 = int_to_ptr.vmem [resolvable:$true] %s2905_s16 }
  0x64   : > { %s2907_s21 = scalar_lea.sflag [#allocation6], %s425_s17  ;;  %p2913_p4 = pneg %p2891_p7 }
  0x66   : > { %s2900_s8 = scalar_lea.hbm %s3374_s1, %s2889_s25  ;;  %s2454_s24 = scalar_lea.hbm %s3374_s1, 256 }
  0x67   : > { %s2449_s15 = scalar_lea.hbm %s2900_s8, 128  ;;  %p2455_p10 = scmp.lt.u32.totalorder %s2900_s8, %s3374_s1 }
  0x68   : > { %p2450_p9 = scmp.ne.s32.totalorder %s2900_s8, %s2449_s15  ;;  %p2456_p12 = scmp.lt.u32.totalorder %s2454_s24, %s2449_s15 }
  0x69   : > { %s3375_s3 = scalar_select %p2913_p4, 1, 0 }
  0x6a   : > { %p2452_p1 = pnand %p2913_p4, %p2450_p9  ;;  %p2457_p13 = por %p2456_p12, %p2455_p10 }
  0x6b   : > { %p2458_p0 = scmp.lt.u32.totalorder %s2449_s15, %s2900_s8 }
  0x6c   : > { %p2453_p3 = pneg %p2452_p1 }
  0x6d   : > { %p2459_p5 = por %p2458_p0, %p2457_p13 }
  0x6f   : > { %p2460_p2 = pnand %p2459_p5, %p2453_p3 }
  0x71   : > { %2463 = shalt.err (!%p2460_p2)
}
  0x72   : > { %s2464_s17 = scalar_lea.vmem %s2903_s29, 128  ;;  %s2680_s12 = smov [#allocation5]  }
  0x73   : > { %p2465_p9 = scmp.ne.s32.totalorder %s2903_s29, %s2464_s17  ;;  %s2469_s30 = sshll.u32 %s2680_s12, 4  ;;  %s2470_s30 = int_to_ptr.vmem [resolvable:$false] %s2469_s30 }
  0x74   : > { %s2471_s11 = scalar_lea.vmem %s2470_s30, 256  ;;  %p2472_p6 = scmp.lt.s32.totalorder %s2903_s29, %s2470_s30 }
  0x75   : > { %p2467_p1 = pnand %p2465_p9, %p2913_p4  ;;  %p2473_p8 = scmp.lt.s32.totalorder %s2471_s11, %s2464_s17 }
  0x77   : > { %p2468_p11 = pneg %p2467_p1  ;;  %p2474_p10 = por %p2473_p8, %p2472_p6 }
  0x79   : > { %p2475_p12 = pnand %p2474_p10, %p2468_p11 }
  0x7b   : > { %2478 = shalt.err (!%p2475_p12)
}
  0x7c   : > { %2302 = dma.hbm_to_vmem [thread:$0]  (!%p2891_p7), %s2900_s8, 128, %s2903_s29, %s2907_s21  }
  0x7d   : > { %s2479_s18 = scalar_lea.hbm %s3317_s4, 256  ;;  %p3376_p6 = scmp.ne.s32.totalorder %s3363_s19, 0 }
  0x7e   : > { %p2480_p2 = scmp.ne.s32.totalorder %s3317_s4, %s2479_s18  ;;  %p2486_p5 = scmp.lt.u32.totalorder %s2479_s18, %s3317_s4 }
  0x80   : > { %p2482_p8 = pnand %p2480_p2, %p3376_p6 }
  0x82   : > { %p2483_p11 = pneg %p2482_p8 }
  0x84   : > { %p2488_p3 = pnand %p2486_p5, %p2483_p11 }
  0x86   : > { %2491 = shalt.err (!%p2488_p3)
}
  0x87   : > { %s2492_s11 = scalar_lea.vmem %s355_s16, 256  ;;  %p2500_p1 = scmp.lt.s32.totalorder %s355_s16, %s355_s16 }
  0x88   : > { %p2493_p13 = scmp.ne.s32.totalorder %s355_s16, %s2492_s11  ;;  %p2501_p10 = scmp.lt.s32.totalorder %s2492_s11, %s2492_s11 }
  0x8a   : > { %p2495_p0 = pnand %p2493_p13, %p3376_p6  ;;  %p2502_p12 = por %p2501_p10, %p2500_p1 }
  0x8c   : > { %p2496_p9 = pneg %p2495_p0 }
  0x8e   : > { %p2503_p7 = pnand %p2502_p12, %p2496_p9 }
  0x90   : > { %2506 = shalt.err (!%p2503_p7)
}
  0x91   : > { %p3377_p2 = scmp.ne.s32.totalorder %s3361_s13, 0  ;;  %s3378_s1 = smov 4  }
  0x92   : > { %s3379_s8 = smov 64   ;;  %s2681_s15 = smov [#allocation13]  }
  0x93   : > { %2289 = dma.hbm_to_vmem [thread:$0]  (!%p3377_p2), %s3317_s4, 256, %s355_s16, [#allocation9], %s3379_s8, %s3379_s8, %s3378_s1  }
  0x94   : > { %s390_s18 = sshll.u32 %s2681_s15, 4  ;;  %s2507_s30 = scalar_lea.hbm %s3322_s9, 16  ;;  %s391_s18 = int_to_ptr.vmem [resolvable:$true] %s390_s18 }
  0x95   : > { %p2508_p7 = scmp.ne.s32.totalorder %s3322_s9, %s2507_s30  ;;  %p2514_p5 = scmp.lt.u32.totalorder %s2507_s30, %s3322_s9 }
  0x97   : > { %p2510_p8 = pnand %p2508_p7, %p3376_p6 }
  0x99   : > { %p2511_p11 = pneg %p2510_p8 }
  0x9b   : > { %p2516_p3 = pnand %p2514_p5, %p2511_p11 }
  0x9d   : > { %2519 = shalt.err (!%p2516_p3)
}
  0x9e   : > { %s2520_s16 = scalar_lea.vmem %s391_s18, 16  ;;  %s2527_s1 = scalar_lea.vmem %s391_s18, 32 }
  0x9f   : > { %p2521_p13 = scmp.ne.s32.totalorder %s391_s18, %s2520_s16  ;;  %p2528_p1 = scmp.lt.s32.totalorder %s391_s18, %s391_s18 }
  0xa0   : > { %p2529_p10 = scmp.lt.s32.totalorder %s2527_s1, %s2520_s16 }
  0xa1   : > { %p2523_p0 = pnand %p2521_p13, %p3376_p6 }
  0xa2   : > { %p2530_p12 = por %p2529_p10, %p2528_p1 }
  0xa3   : > { %p2524_p9 = pneg %p2523_p0 }
  0xa5   : > { %p2531_p4 = pnand %p2530_p12, %p2524_p9 }
  0xa7   : > { %2534 = shalt.err (!%p2531_p4)
}
  0xa8   : > { %2295 = dma.hbm_to_vmem [thread:$0]  (!%p3377_p2), %s3322_s9, 16, %s391_s18, [#allocation12]  }
  0xa9   : > { %s2981_s19 = scalar_lea.hbm %s3313_s0, %s2889_s25  ;;  %s411_s29 = scalar_lea.vmem [#allocation2], %s2886_s20 }
  0xaa   : > { %s418_s24 = sshll.u32 %s411_s29, 4  ;;  %s3380_s13 = sand.u32 1, %s2669_s23   ;;  %s419_s24 = int_to_ptr.vmem [resolvable:$true] %s418_s24 }
  0xab   : > { %s408_s15 = scalar_lea.sflag [#allocation3], %s3380_s13  ;;  %s2535_s12 = scalar_lea.hbm %s2981_s19, 128 }
  0xac   : > { %p2536_p4 = scmp.ne.s32.totalorder %s2981_s19, %s2535_s12  ;;  %p3381_p6 = scmp.ne.s32.totalorder %s3375_s3, 0 }
  0xad   : > { %s2540_s30 = scalar_lea.hbm %s3313_s0, 256  ;;  %p2541_p2 = scmp.lt.u32.totalorder %s2981_s19, %s3313_s0 }
  0xae   : > { %p2538_p7 = pnand %p2536_p4, %p3381_p6  ;;  %p2542_p11 = scmp.lt.u32.totalorder %s2540_s30, %s2535_s12 }
  0xaf   : > { %p2544_p3 = scmp.lt.u32.totalorder %s2535_s12, %s2981_s19 }
  0xb0   : > { %p2539_p8 = pneg %p2538_p7  ;;  %p2543_p5 = por %p2542_p11, %p2541_p2 }
  0xb2   : > { %p2545_p13 = por %p2544_p3, %p2543_p5 }
  0xb4   : > { %p2546_p0 = pnand %p2545_p13, %p2539_p8 }
  0xb6   : > { %2549 = shalt.err (!%p2546_p0)
}
  0xb7   : > { %s2550_s1 = scalar_lea.vmem %s419_s24, 128  ;;  %s2682_s10 = smov [#allocation2]  }
  0xb8   : > { %p2551_p9 = scmp.ne.s32.totalorder %s419_s24, %s2550_s1  ;;  %s2555_s8 = sshll.u32 %s2682_s10, 4  ;;  %s2556_s8 = int_to_ptr.vmem [resolvable:$false] %s2555_s8 }
  0xb9   : > { %s2557_s5 = scalar_lea.vmem %s2556_s8, 256  ;;  %p2558_p12 = scmp.lt.s32.totalorder %s419_s24, %s2556_s8 }
  0xba   : > { %p2553_p1 = pnand %p2551_p9, %p3381_p6  ;;  %p2559_p4 = scmp.lt.s32.totalorder %s2557_s5, %s2550_s1 }
  0xbc   : > { %p2554_p10 = pneg %p2553_p1  ;;  %p2560_p7 = por %p2559_p4, %p2558_p12 }
  0xbe   : > { %p2561_p2 = pnand %p2560_p7, %p2554_p10 }
  0xc0   : > { %2564 = shalt.err (!%p2561_p2)
}
  0xc1   : > { %p3382_p11 = scmp.ne.s32.totalorder %s3373_s14, 0  ;;  %s3007_s13 = scalar_lea.hbm %s3315_s2, %s2889_s25 }
  0xc2   : > { %s447_s12 = scalar_lea.vmem [#allocation7], %s2886_s20  ;;  %s2565_s17 = scalar_lea.hbm %s3007_s13, 128 }
  0xc3   : > { %2299 = dma.hbm_to_vmem [thread:$0]  (!%p3382_p11), %s2981_s19, 128, %s419_s24, %s408_s15  }
  0xc4   : > { %s454_s18 = sshll.u32 %s447_s12, 4  ;;  %p2566_p8 = scmp.ne.s32.totalorder %s3007_s13, %s2565_s17  ;;  %s455_s18 = int_to_ptr.vmem [resolvable:$true] %s454_s18 }
  0xc5   : > { %s2570_s19 = scalar_lea.hbm %s3315_s2, 256  ;;  %p2571_p13 = scmp.lt.u32.totalorder %s3007_s13, %s3315_s2 }
  0xc6   : > { %p2568_p5 = pnand %p2566_p8, %p3381_p6  ;;  %p2572_p0 = scmp.lt.u32.totalorder %s2570_s19, %s2565_s17 }
  0xc7   : > { %p2574_p1 = scmp.lt.u32.totalorder %s2565_s17, %s3007_s13 }
  0xc8   : > { %p2569_p3 = pneg %p2568_p5  ;;  %p2573_p9 = por %p2572_p0, %p2571_p13 }
  0xca   : > { %p2575_p10 = por %p2574_p1, %p2573_p9 }
  0xcc   : > { %p2576_p12 = pnand %p2575_p10, %p2569_p3 }
  0xce   : > { %2579 = shalt.err (!%p2576_p12)
}
  0xcf   : > { %s2580_s20 = scalar_lea.vmem %s455_s18, 128  ;;  %s2683_s25 = smov [#allocation7]  }
  0xd0   : > { %p2581_p4 = scmp.ne.s32.totalorder %s455_s18, %s2580_s20  ;;  %s2585_s16 = sshll.u32 %s2683_s25, 4  ;;  %s2586_s16 = int_to_ptr.vmem [resolvable:$false] %s2585_s16 }
  0xd1   : > { %s2587_s1 = scalar_lea.vmem %s2586_s16, 256  ;;  %p2588_p8 = scmp.lt.s32.totalorder %s455_s18, %s2586_s16 }
  0xd2   : > { %p2583_p7 = pnand %p2581_p4, %p3381_p6  ;;  %p2589_p5 = scmp.lt.s32.totalorder %s2587_s1, %s2580_s20 }
  0xd4   : > { %p2584_p2 = pneg %p2583_p7  ;;  %p2590_p11 = por %p2589_p5, %p2588_p8 }
  0xd6   : > { %p2591_p0 = pnand %p2590_p11, %p2584_p2 }
  0xd8   : > { %2594 = shalt.err (!%p2591_p0)
}
  0xd9   : > { %p3383_p13 = scmp.ne.s32.totalorder %s3373_s14, 0  ;;  %p3384_p3 = scmp.ne.s32.totalorder %s3360_s28, 0 }
  0xda   : > { %s3031_s3 = sand.u32 (!%p3384_p3), 1, %s2665_s22   ;;  %p3385_p6 = scmp.ne.s32.totalorder (!%p3384_p3), %s3368_s26, 0 }
  0xdb   : > { %2305 = dma.hbm_to_vmem [thread:$0]  (!%p3383_p13), %s3007_s13, 128, %s455_s18, %s2907_s21  }
  0xdc   : > { %463 = sbr.rel (%p3384_p3) target bundleno = 1789 (0x6fd), region = 68  ;;  %s3034_s10 = sshll.u32 (!%p3384_p3), %s3031_s3, 3 }
  0xdd   : > { %s466_s8 = scalar_lea.sflag (!%p3384_p3), [#allocation3], %s3031_s3  ;;  %s469_s5 = scalar_lea.vmem (!%p3384_p3), [#allocation2], %s3034_s10 }
  0xe3   : > { %2640 = dma.done.wait (%p3385_p6), %s466_s8, 128  }
  0xe4   : > { %2642 = vsyncadd (%p3385_p6), %s466_s8, 4294967168  ;;  %s474_s21 = sand.u32 1, %s2782_s27   ;;  %s478_s14 = scalar_lea.vmem [#allocation5], %s3034_s10 }
  0xe5   : > { %s475_s28 = scalar_lea.sflag [#allocation6], %s474_s21 }
  0xe6   : > { %2644 = dma.done.wait (%p3385_p6), %s475_s28, 256  }
  0xe7   : > { %2646 = vsyncadd (%p3385_p6), %s475_s28, 4294967040  ;;  %s487_s7 = scalar_lea.vmem [#allocation7], %s3034_s10  ;;  %p3386_p11 = scmp.eq.s32.totalorder %s2782_s27, 0 }
  0xe9   : > { %2648 = dma.done.wait (%p3386_p11), [#allocation9], 384   ;;  %p3387_p9 = pmov %p3386_p11 }
  0xeb   : > { %2650 = vsyncadd (%p3387_p9), [#allocation9], 4294966912  ;;  %p3388_p1 = pmov %p3387_p9 }
  0xed   : > { %2652 = dma.done.wait (%p3388_p1), [#allocation12], 272   ;;  %p3389_p10 = pmov %p3388_p1 }
  0xee   : > { %v2684_v0 = vmov 0.0   ;;  %vm2685_vm0 = vmmov 0   ;;  %v2369_v1 = vld [vmem:[%s3319_s6] sm:$0xff]   ;;  %v2370_v2 = vld [vmem:[#allocation10] sm:$0xff]   ;;  %v2371_v3 = vld [vmem:[%s3319_s6 + $0x8] sm:$0xff]   ;;  %vm580_vm1 = vcmask 261120   ;;  %v771_v29 = vlaneseq }
  0xef   : > { %2654 = vsyncadd (%p3389_p10), [#allocation12], 4294967024  ;;  %2187 = vmatprep.subr.bf16.mxu1 %v2684_v0  ;;  %2179 = vmatprep.subr.bf16.mxu0 %v2684_v0  ;;  %v624_v4 = vld [vmem:[%s478_s14] sm:$0xff]  ;;  %v2372_v5 = vld [vmem:[#allocation10 + $0x8] sm:$0xff]   ;;  %s3390_s30 = sld [smem:[#allocation29_spill]]  ;;  %s3391_s24 = sld [smem:[#allocation28_spill]] }
  0xf0   : > { %2191 = vmatprep.mubr.msk.bf16.mxu1 %vm2685_vm0, %v2684_v0  ;;  %2183 = vmatprep.mubr.msk.bf16.mxu0 %vm2685_vm0, %v2684_v0  ;;  %v555_v6 = vld [vmem:[%s469_s5] sm:$0xff]  ;;  %v625_v7 = vpack.c.bf16 %v624_v4, %v624_v4  ;;  %s2686_s15 = smov 104   ;;  %s2687_s20 = smov 120   ;;  %v2374_v24 = vld [vmem:[#allocation11 + $0x8] sm:$0xff]   ;;  %v2689_v27 = vmov 1983009808  }
  0xf1   : > { %2188 = vmatpush3.bf16.msra.mxu1 %v2369_v1  ;;  %2180 = vmatpush3.bf16.msra.mxu0 %v2370_v2  ;;  %v556_v8 = vpack.c.bf16 %v555_v6, %v555_v6  ;;  %s2688_s25 = smov 112   ;;  %v2373_v23 = vld [vmem:[#allocation11] sm:$0xff]   ;;  %v769_v28 = vunpack.c.l.s4 %v2689_v27  ;;  %v2690_v30 = vmov 1934713408   ;;  %v3098_v33 = vshrl.u32 %v771_v29, 7  ;;  %s3392_s8 = sld [smem:[#allocation31_spill]] }
  0xf2   : > { %2189 = vmatprep.subr.bf16.mxu1 %v2684_v0  ;;  %2181 = vmatprep.subr.bf16.mxu0 %v2684_v0  ;;  %v692_v25 = vld [vmem:[%s487_s7] sm:$0xff]  ;;  %v786_v31 = vunpack.c.l.s4 %v2690_v30  ;;  %v2691_v49 = vmov 0   ;;  %vm1268_vm2 = vcmask 64512   ;;  %vm1504_vm3 = vcmask 1043456   ;;  %s2692_s28 = smov 8   ;;  %s2693_s14 = smov 16  }
  0xf3   : > { %v693_v26 = vpack.c.bf16 %v692_v25, %v692_v25  ;;  %v770_v32 = vunpack.c.0.s8 %v769_v28  ;;  %vm1688_vm4 = vcmp.eq.s32.totalorder %v3098_v33, 0  ;;  %s2694_s7 = smov 24   ;;  %vm1864_vm5 = vcmask 130048   ;;  %s3393_s13 = sld [smem:[#allocation32_spill]] }
  0xf4   : > { %v787_v34 = vunpack.c.0.s8 %v786_v31  ;;  %vm1867_vm6 = vcmask 195584   ;;  %s3394_s12 = sld [smem:[#allocation24_spill]]  ;;  %s2148_s18 = sshll.u32 %s2782_s27, 7 }
  0xf5   : > { %2190 = vmatpush3.bf16.msra.mxu1 %v2371_v3  ;;  %2182 = vmatpush3.bf16.msra.mxu0 %v2372_v5  ;;  %v2127_v9 = vld [vmem:[%s3390_s30] ss:$0 sm:$0xff]  ;;  %v3101_v35 = vsub.s32 %v770_v32, %v3098_v33  ;;  %s553_s17 = scalar_lea.vmem [#allocation14], %s3034_s10  ;;  %s1937_s27 = scalar_lea.sflag [#allocation4], %s3031_s3 }
  0xf6   : > { %2203 = vmatprep.subr.bf16.mxu1 %v2684_v0  ;;  %2195 = vmatprep.subr.bf16.mxu0 %v2684_v0  ;;  %v2123_v10 = vld [vmem:[%s3391_s24] ss:$0 sm:$0xff]  ;;  %v3105_v39 = vsub.s32 %v787_v34, %v3098_v33  ;;  %s1950_s30 = sshll.u32 %s553_s17, 4  ;;  %s3395_s24 = sld [smem:[#allocation33_spill]]  ;;  %s3270_s30 = int_to_ptr.vmem [resolvable:$true] %s1950_s30 }
  0xf7   : > { %s2595_s10 = scalar_lea.vmem %s3270_s30, 128 }
  0xf8   : > { %2192 = vmatmul.mubr.msk.bf16.vlgmr.msra.gmra.mrb[0].mxu1 %vm580_vm1, %v625_v7  ;;  %2184 = vmatmul.mubr.msk.bf16.vlgmr.msra.gmra.mrb[0].mxu0 %vm580_vm1, %v556_v8  ;;  %p2596_p12 = scmp.ne.s32.totalorder %s3270_s30, %s2595_s10 }
  0xf9   : > { %2205 = vmatprep.mubr.msk.bf16.mxu1 %vm2685_vm0, %v2684_v0  ;;  %2199 = vmatprep.mubr.msk.bf16.mxu0 %vm2685_vm0, %v2684_v0 }
  0xfa   : > { %2196 = vmatpush3.bf16.msra.mxu0 %v2373_v23  ;;  %p3397_p4 = scmp.ne.s32.totalorder %s3394_s12, 0 }
  0xfb   : > { %2197 = vmatprep.subr.bf16.mxu0 %v2684_v0 }
  0xfc   : > { %p2597_p7 = pnand %p2596_p12, %p3397_p4 }
  0xfe   : > { %2198 = vmatpush3.bf16.msra.mxu0 %v2374_v24  ;;  %p2598_p2 = pneg %p2597_p7 }
  0xff   : > { %2209 = vmatprep.subr.bf16.mxu0 %v2684_v0 }
 0x101   : > { %2200 = vmatmul.mubr.msk.bf16.vlgmr.msra.gmra.mrb[4].mxu0 %vm580_vm1, %v693_v26 }
 0x102   : > { %2211 = vmatprep.mubr.msk.bf16.mxu0 %vm2685_vm0, %v2684_v0 }
 0x1cb   : > { %v686_v11 = vpop.f32.mrb[0].mxu1  ;;  %v618_v14 = vpop.f32.mrb[0].mxu0 }
 0x1cc   : > { %v687_v12 = vadd.f32 %v2127_v9, %v686_v11  ;;  %v2193_v13 = vpop.f32.mrb[1].mxu1  ;;  %v619_v16 = vadd.f32 %v2123_v10, %v618_v14  ;;  %v2185_v17 = vpop.f32.mrb[1].mxu0 }
 0x1cd   : > { %v689_v15 = vpop.f32.mrb[2].mxu1  ;;  %v621_v20 = vpop.f32.mrb[2].mxu0 }
 0x1ce   : > { %v929_v18 = vpack.c.bf16 %v687_v12, %v687_v12  ;;  %v2194_v19 = vpop.f32.mrb[3].mxu1  ;;  %v2186_v21 = vpop.f32.mrb[3].mxu0  ;;  %v760_v22 = vpack.c.bf16 %v619_v16, %v619_v16 }
 0x1d0   : > { %935 = vrot.lane.b32.xlu1 %v929_v18, %s2686_s15  ;;  %931 = vrot.lane.b32.xlu0 %v929_v18, %s2687_s20  ;;  %v943_v48 = vrot.slane %v929_v18, %v3101_v35  ;;  %v774_v56 = vrot.slane %v760_v22, %v3101_v35 }
 0x1d4   : > { %933 = vrot.lane.b32.xlu0 %v929_v18, %s2688_s25  ;;  %762 = vrot.lane.b32.xlu1 %v760_v22, %s2687_s20 }
 0x1d8   : > { %764 = vrot.lane.b32.xlu0 %v760_v22, %s2688_s25  ;;  %766 = vrot.lane.b32.xlu1 %v760_v22, %s2686_s15 }
 0x242   : > { %v936_v36 = vpop.permute.xlu1 %935  ;;  %v932_v37 = vpop.permute.xlu0 %931 }
 0x243   : > { %v985_v38 = vrot.slane %v936_v36, %v3101_v35  ;;  %v977_v40 = vrot.slane %v932_v37, %v3101_v35 }
 0x245   : > { %v986_v41 = vcombine.low %v977_v40, %v985_v38  ;;  %v987_v42 = vcombine.high %v977_v40, %v985_v38 }
 0x246   : > { %v934_v43 = vpop.permute.xlu0 %933  ;;  %v763_v44 = vpop.permute.xlu1 %762 }
 0x247   : > { %v994_v45 = vrot.slane %v986_v41, %v3105_v39  ;;  %v1001_v46 = vrot.slane %v987_v42, %v3105_v39  ;;  %v951_v47 = vrot.slane %v934_v43, %v3101_v35  ;;  %v808_v52 = vrot.slane %v763_v44, %v3101_v35 }
 0x249   : > { %v1002_v50 = vcombine.high %v994_v45, %v2691_v49  ;;  %v1003_v51 = vcombine.high %v1001_v46, %v2691_v49  ;;  %v952_v53 = vcombine.low %v943_v48, %v951_v47  ;;  %v953_v54 = vcombine.high %v943_v48, %v951_v47 }
 0x24a   : > { %v765_v55 = vpop.permute.xlu0 %764  ;;  %v767_v57 = vpop.permute.xlu1 %766  ;;  %v1009_v58 = vshrl.u32 %v994_v45, 16  ;;  %v1025_v59 = vshrl.u32 %v1001_v46, 16 }
 0x24b   : > { %v782_v60 = vrot.slane %v765_v55, %v3101_v35  ;;  %v816_v61 = vrot.slane %v767_v57, %v3101_v35  ;;  %v1017_v62 = vshrl.u32 %v1002_v50, 16  ;;  %v1033_v63 = vshrl.u32 %v1003_v51, 16 }
 0x24c   : > { %v960_v1 = vrot.slane %v952_v53, %v3105_v39  ;;  %v967_v2 = vrot.slane %v953_v54, %v3105_v39 }
 0x24d   : > { %v783_v3 = vcombine.low %v774_v56, %v782_v60  ;;  %v784_v4 = vcombine.high %v774_v56, %v782_v60  ;;  %v817_v5 = vcombine.low %v808_v52, %v816_v61  ;;  %v818_v6 = vcombine.high %v808_v52, %v816_v61 }
 0x24e   : > { %v968_v7 = vcombine.high %v960_v1, %v2691_v49  ;;  %v969_v8 = vcombine.high %v967_v2, %v2691_v49  ;;  %v1006_v9 = vpack.i.b16 %v994_v45, %v960_v1  ;;  %v1008_v10 = vshrl.u32 %v960_v1, 16 }
 0x24f   : > { %v1022_v11 = vpack.i.b16 %v1001_v46, %v967_v2  ;;  %v1024_v12 = vshrl.u32 %v967_v2, 16  ;;  %v791_v13 = vrot.slane %v783_v3, %v3105_v39  ;;  %v798_v14 = vrot.slane %v784_v4, %v3105_v39 }
 0x250   : > { %v1010_v15 = vpack.i.b16 %v1009_v58, %v1008_v10  ;;  %v1014_v16 = vpack.i.b16 %v1002_v50, %v968_v7  ;;  %v1016_v17 = vshrl.u32 %v968_v7, 16  ;;  %v1030_v18 = vpack.i.b16 %v1003_v51, %v969_v8 }
 0x251   : > { %v1026_v19 = vpack.i.b16 %v1025_v59, %v1024_v12  ;;  %v1032_v20 = vshrl.u32 %v969_v8, 16  ;;  %v1036_v21 = vcombine.low %v1006_v9, %v1022_v11  ;;  %v799_v22 = vcombine.high %v791_v13, %v2691_v49 }
 0x252   : > { %v1018_v23 = vpack.i.b16 %v1017_v62, %v1016_v17  ;;  %v1044_v24 = vcombine.low %v1014_v16, %v1030_v18  ;;  %v800_v25 = vcombine.high %v798_v14, %v2691_v49  ;;  %v839_v29 = vshrl.u32 %v791_v13, 16 }
 0x253   : > { %v1034_v26 = vpack.i.b16 %v1033_v63, %v1032_v20  ;;  %v1043_v27 = vrot.slane %v1036_v21, %v3101_v35  ;;  %v1061_v28 = vcombine.low %v1010_v15, %v1026_v19  ;;  %v847_v30 = vshrl.u32 %v799_v22, 16 }
 0x254   : > { %v855_v31 = vshrl.u32 %v798_v14, 16  ;;  %v825_v32 = vrot.slane %v817_v5, %v3105_v39  ;;  %v832_v34 = vrot.slane %v818_v6, %v3105_v39  ;;  %v863_v37 = vshrl.u32 %v800_v25, 16 }
 0x255   : > { %v1069_v36 = vcombine.low %v1018_v23, %v1034_v26  ;;  %v1051_v38 = vrot.slane %v1044_v24, %v3101_v35  ;;  %v1068_v40 = vrot.slane %v1061_v28, %v3101_v35 }
 0x256   : > { %v833_v41 = vcombine.high %v825_v32, %v2691_v49  ;;  %v834_v42 = vcombine.high %v832_v34, %v2691_v49  ;;  %v837_v43 = vpack.i.b16 %v825_v32, %v791_v13  ;;  %v840_v44 = vshrl.u32 %v825_v32, 16 }
 0x257   : > { %v853_v45 = vpack.i.b16 %v832_v34, %v798_v14  ;;  %v856_v46 = vshrl.u32 %v832_v34, 16  ;;  %v1052_v47 = vcombine.low %v1043_v27, %v1051_v38  ;;  %v1076_v48 = vrot.slane %v1069_v36, %v3101_v35  ;;  %v754_v36 = vpop.f32.mrb[4].mxu0 }
 0x258   : > { %v841_v50 = vpack.i.b16 %v840_v44, %v839_v29  ;;  %v845_v51 = vpack.i.b16 %v833_v41, %v799_v22  ;;  %v848_v52 = vshrl.u32 %v833_v41, 16  ;;  %v861_v53 = vpack.i.b16 %v834_v42, %v800_v25  ;;  %v1267_v41 = vld [vmem:[#allocation8] sm:$0xff] }
 0x259   : > { %v857_v54 = vpack.i.b16 %v856_v46, %v855_v31  ;;  %v864_v55 = vshrl.u32 %v834_v42, 16  ;;  %v867_v56 = vcombine.low %v837_v43, %v853_v45  ;;  %v1059_v57 = vrot.slane %v1052_v47, %v3105_v39 }
 0x25a   : > { %v849_v58 = vpack.i.b16 %v848_v52, %v847_v30  ;;  %v875_v59 = vcombine.low %v845_v51, %v861_v53  ;;  %v1077_v60 = vcombine.low %v1068_v40, %v1076_v48 }
 0x25b   : > { %v865_v61 = vpack.i.b16 %v864_v55, %v863_v37  ;;  %v892_v62 = vcombine.low %v841_v50, %v857_v54  ;;  %v874_v63 = vrot.slane %v867_v56, %v3101_v35  ;;  %v1089_v4 = vshrl.u32 %v1059_v57, 16  ;;  %v2201_v37 = vpop.f32.mrb[5].mxu0 }
 0x25c   : > { %v882_v1 = vrot.slane %v875_v59, %v3101_v35  ;;  %v1084_v2 = vrot.slane %v1077_v60, %v3105_v39  ;;  %v1060_v13 = vcombine.high %v1059_v57, %v2691_v49  ;;  %v757_v38 = vpop.f32.mrb[6].mxu0 }
 0x25d   : > { %v900_v3 = vcombine.low %v849_v58, %v865_v61  ;;  %v899_v9 = vrot.slane %v892_v62, %v3101_v35  ;;  %v2202_v40 = vpop.f32.mrb[7].mxu0 }
 0x25e   : > { %v883_v5 = vcombine.low %v874_v63, %v882_v1  ;;  %v1088_v6 = vpack.i.b16 %v1084_v2, %v1059_v57  ;;  %v1090_v7 = vshrl.u32 %v1084_v2, 16  ;;  %v1085_v8 = vcombine.high %v1084_v2, %v2691_v49 }
 0x25f   : > { %v907_v10 = vrot.slane %v900_v3, %v3101_v35  ;;  %v1095_v20 = vshrl.u32 %v1060_v13, 16  ;;  %v2131_v3 = vld [vmem:[#allocation13] ss:$0 sm:$0xff] }
 0x260   : > { %v1273_v11 = vsel %vm1268_vm2, %v1088_v6, 0  ;;  %v1091_v12 = vpack.i.b16 %v1090_v7, %v1089_v4  ;;  %v890_v16 = vrot.slane %v883_v5, %v3105_v39  ;;  %v1096_v17 = vshrl.u32 %v1085_v8, 16 }
 0x261   : > { %v908_v14 = vcombine.low %v899_v9, %v907_v10  ;;  %2204 = vmatpush3.bf16.xpose.msra.mxu1 %v1273_v11  ;;  %v1094_v19 = vpack.i.b16 %v1085_v8, %v1060_v13  ;;  %v755_v5 = vadd.f32 %v2131_v3, %v754_v36 }
 0x262   : > { %v1319_v15 = vsel %vm1268_vm2, %v1091_v12, 0  ;;  %2215 = vmatprep.subr.bf16.mxu1 %v2684_v0  ;;  %v920_v23 = vshrl.u32 %v890_v16, 16  ;;  %v1097_v24 = vpack.i.b16 %v1096_v17, %v1095_v20  ;;  %v891_v29 = vcombine.high %v890_v16, %v2691_v49 }
 0x263   : > { %2210 = vmatpush3.bf16.xpose.msra.mxu0 %v1319_v15  ;;  %v915_v18 = vrot.slane %v908_v14, %v3105_v39  ;;  %v1365_v25 = vsel %vm1268_vm2, %v1094_v19, 0  ;;  %v1098_v6 = vpack.c.bf16 %v755_v5, %v755_v5 }
 0x264   : > { %2221 = vmatprep.subr.bf16.mxu0 %v2684_v0  ;;  %v1411_v28 = vsel %vm1268_vm2, %v1097_v24, 0  ;;  %v926_v32 = vshrl.u32 %v891_v29, 16 }
 0x265   : > { %v921_v21 = vshrl.u32 %v915_v18, 16  ;;  %v919_v22 = vpack.i.b16 %v915_v18, %v890_v16  ;;  %v916_v27 = vcombine.high %v915_v18, %v2691_v49  ;;  %v1112_v38 = vrot.slane %v1098_v6, %v3101_v35 }
 0x267   : > { %v922_v26 = vpack.i.b16 %v921_v21, %v920_v23  ;;  %v927_v30 = vshrl.u32 %v916_v27, 16  ;;  %v925_v31 = vpack.i.b16 %v916_v27, %v891_v29 }
 0x268   : > { %2206 = vmatmul.mubr.msk.bf16.vlgmr.msra.gmra.mrb[4].mxu1 %vm1268_vm2, %v919_v22 }
 0x269   : > { %2216 = vmatpush3.bf16.xpose.msra.mxu1 %v1365_v25  ;;  %2217 = vmatprep.mubr.msk.bf16.mxu1 %vm2685_vm0, %v2684_v0  ;;  %v928_v34 = vpack.i.b16 %v927_v30, %v926_v32 }
 0x26a   : > { %2212 = vmatmul.mubr.msk.bf16.vlgmr.msra.gmra.mrb[8].mxu0 %vm1268_vm2, %v922_v26  ;;  %2227 = vmatprep.subr.bf16.mxu1 %v2684_v0 }
 0x26b   : > { %2222 = vmatpush3.bf16.xpose.msra.mxu0 %v1411_v28  ;;  %2223 = vmatprep.mubr.msk.bf16.mxu0 %vm2685_vm0, %v2684_v0 }
 0x26c   : > { %2233 = vmatprep.subr.bf16.mxu0 %v2684_v0 }
 0x270   : > { %2218 = vmatmul.mubr.msk.bf16.vlgmr.msra.gmra.mrb[8].mxu1 %vm1268_vm2, %v925_v31 }
 0x271   : > { %2229 = vmatprep.mubr.msk.bf16.mxu1 %vm2685_vm0, %v2684_v0 }
 0x272   : > { %2224 = vmatmul.mubr.msk.bf16.vlgmr.msra.gmra.mrb[12].mxu0 %vm1268_vm2, %v928_v34 }
 0x273   : > { %2235 = vmatprep.mubr.msk.bf16.mxu0 %vm2685_vm0, %v2684_v0 }
 0x33b   : > { %v1309_v42 = vpop.f32.mrb[4].mxu1 }
 0x33c   : > { %v1310_v43 = vadd.f32 %v1309_v42, %v1267_v41  ;;  %v2207_v44 = vpop.f32.mrb[5].mxu1 }
 0x33d   : > { %v1312_v45 = vpop.f32.mrb[6].mxu1  ;;  %v1355_v46 = vpop.f32.mrb[8].mxu0 }
 0x33e   : > { %v1356_v47 = vadd.f32 %v1355_v46, %v1267_v41  ;;  %v2208_v48 = vpop.f32.mrb[7].mxu1  ;;  %v2213_v50 = vpop.f32.mrb[9].mxu0  ;;  %v1453_v51 = vsel %vm1268_vm2, %v1310_v43, -inf }
 0x33f   : > { %1454 = vmax.xlane.f32.xlu0 %v1453_v51  ;;  %v1358_v52 = vpop.f32.mrb[10].mxu0 }
 0x340   : > { %v2214_v53 = vpop.f32.mrb[11].mxu0  ;;  %v1456_v54 = vsel %vm1268_vm2, %v1356_v47, -inf }
 0x341   : > { %1457 = vmax.xlane.f32.xlu1 %v1456_v54 }
 0x343   : > { %v1401_v55 = vpop.f32.mrb[8].mxu1 }
 0x344   : > { %v1402_v56 = vadd.f32 %v1401_v55, %v1267_v41  ;;  %v2219_v57 = vpop.f32.mrb[9].mxu1 }
 0x345   : > { %v1404_v58 = vpop.f32.mrb[10].mxu1  ;;  %v1447_v59 = vpop.f32.mrb[12].mxu0 }
 0x346   : > { %v1448_v60 = vadd.f32 %v1447_v59, %v1267_v41  ;;  %v2220_v61 = vpop.f32.mrb[11].mxu1  ;;  %v2225_v62 = vpop.f32.mrb[13].mxu0  ;;  %v1459_v63 = vsel %vm1268_vm2, %v1402_v56, -inf }
 0x347   : > { %1460 = vmax.xlane.f32.xlu0 %v1459_v63  ;;  %v1450_v1 = vpop.f32.mrb[14].mxu0 }
 0x348   : > { %v2226_v2 = vpop.f32.mrb[15].mxu0  ;;  %v1462_v4 = vsel %vm1268_vm2, %v1448_v60, -inf }
 0x34b   : > { %1463 = vmax.xlane.f32.xlu0 %v1462_v4 }
 0x352   : > { %1100 = vrot.lane.b32.xlu1 %v1098_v6, %s2687_s20  ;;  %s3268_s20 = scalar_lea.hbm %s3395_s24, %s2148_s18 }
 0x3cc   : > { %v1455_v7 = vpop.xlane.xlu0 %1454 }
 0x3cd   : > { %v1465_v8 = vsub.f32 %v1310_v43, %v1455_v7 }
 0x3ce   : > { %v1458_v9 = vpop.xlane.xlu1 %1457 }
 0x3cf   : > { %v1469_v10 = vmul.f32 1.442695, %v1465_v8  ;;  %v1466_v11 = vsub.f32 %v1356_v47, %v1458_v9 }
 0x3d1   : > { %2377 = vpow2.f32 %v1469_v10  ;;  %v1471_v12 = vmul.f32 1.442695, %v1466_v11 }
 0x3d2   : > { %v1101_v27 = vpop.permute.xlu1 %1100 }
 0x3d3   : > { %2379 = vpow2.f32 %v1471_v12  ;;  %v1146_v31 = vrot.slane %v1101_v27, %v3101_v35 }
 0x3d4   : > { %v1461_v17 = vpop.xlane.xlu0 %1460 }
 0x3d5   : > { %v1467_v19 = vsub.f32 %v1402_v56, %v1461_v17 }
 0x3d7   : > { %v1473_v21 = vmul.f32 1.442695, %v1467_v19 }
 0x3d8   : > { %v1464_v18 = vpop.xlane.xlu0 %1463 }
 0x3d9   : > { %v1468_v20 = vsub.f32 %v1448_v60, %v1464_v18  ;;  %2381 = vpow2.f32 %v1473_v21 }
 0x3db   : > { %v3171_v13 = vpop.eup %2377  ;;  %v1475_v22 = vmul.f32 1.442695, %v1468_v20 }
 0x3dc   : > { %v1477_v14 = vsel %vm1268_vm2, %v3171_v13, 0.0 }
 0x3dd   : > { %v3175_v15 = vpop.eup %2379  ;;  %1478 = vadd.xlane.f32.xlu1 %v1477_v14  ;;  %2383 = vpow2.f32 %v1475_v22 }
 0x3de   : > { %v1480_v16 = vsel %vm1268_vm2, %v3175_v15, 0.0 }
 0x3df   : > { %1481 = vadd.xlane.f32.xlu0 %v1480_v16 }
 0x3e3   : > { %v3181_v23 = vpop.eup %2381 }
 0x3e4   : > { %v1483_v25 = vsel %vm1268_vm2, %v3181_v23, 0.0 }
 0x3e7   : > { %v3183_v24 = vpop.eup %2383 }
 0x3e8   : > { %v1486_v26 = vsel %vm1268_vm2, %v3183_v24, 0.0 }
 0x3ee   : > { %1104 = vrot.lane.b32.xlu1 %v1098_v6, %s2686_s15  ;;  %s3396_s15 = smov %s3395_s24 }
 0x3f5   : > { %1102 = vrot.lane.b32.xlu0 %v1098_v6, %s2688_s25  ;;  %s2695_s25 = smov [#allocation14]  }
 0x3f6   : > { %s2599_s16 = sshll.u32 %s2695_s25, 4  ;;  %s2600_s16 = int_to_ptr.vmem [resolvable:$false] %s2599_s16 }
 0x3f7   : > { %s2601_s1 = scalar_lea.vmem %s2600_s16, 256  ;;  %p2602_p8 = scmp.lt.s32.totalorder %s3270_s30, %s2600_s16 }
 0x3f8   : > { %p2603_p5 = scmp.lt.s32.totalorder %s2601_s1, %s2595_s10 }
 0x3fa   : > { %p2604_p0 = por %p2603_p5, %p2602_p8 }
 0x3fc   : > { %p2605_p13 = pnand %p2604_p0, %p2598_p2 }
 0x412   : > { %1484 = vadd.xlane.f32.xlu1 %v1483_v25 }
 0x414   : > { %1487 = vadd.xlane.f32.xlu0 %v1486_v26 }
 0x46a   : > { %v1479_v28 = vpop.xlane.xlu1 %1478 }
 0x46b   : > { %2385 = vrcp.f32 %v1479_v28 }
 0x46c   : > { %v1482_v29 = vpop.xlane.xlu0 %1481 }
 0x46d   : > { %2387 = vrcp.f32 %v1482_v29 }
 0x46e   : > { %v1105_v30 = vpop.permute.xlu1 %1104 }
 0x46f   : > { %v1154_v32 = vrot.slane %v1105_v30, %v3101_v35 }
 0x470   : > { %v1103_v34 = vpop.permute.xlu0 %1102 }
 0x471   : > { %v1155_v36 = vcombine.low %v1146_v31, %v1154_v32  ;;  %v1156_v37 = vcombine.high %v1146_v31, %v1154_v32  ;;  %v1120_v40 = vrot.slane %v1103_v34, %v3101_v35 }
 0x473   : > { %v1163_v41 = vrot.slane %v1155_v36, %v3105_v39  ;;  %v1170_v42 = vrot.slane %v1156_v37, %v3105_v39  ;;  %v1121_v43 = vcombine.low %v1112_v38, %v1120_v40  ;;  %v1122_v44 = vcombine.high %v1112_v38, %v1120_v40 }
 0x475   : > { %v1171_v45 = vcombine.high %v1163_v41, %v2691_v49  ;;  %v1172_v46 = vcombine.high %v1170_v42, %v2691_v49  ;;  %v1129_v47 = vrot.slane %v1121_v43, %v3105_v39  ;;  %v1136_v48 = vrot.slane %v1122_v44, %v3105_v39  ;;  %v2386_v11 = vpop.eup %2385 }
 0x476   : > { %v1178_v50 = vshrl.u32 %v1163_v41, 16  ;;  %v1194_v51 = vshrl.u32 %v1170_v42, 16  ;;  %v1493_v22 = vmul.f32 %v2386_v11, %v3171_v13 }
 0x477   : > { %v1186_v52 = vshrl.u32 %v1171_v45, 16  ;;  %v1137_v53 = vcombine.high %v1129_v47, %v2691_v49  ;;  %v1138_v54 = vcombine.high %v1136_v48, %v2691_v49  ;;  %v1175_v55 = vpack.i.b16 %v1163_v41, %v1129_v47  ;;  %v2388_v17 = vpop.eup %2387 }
 0x478   : > { %v1202_v56 = vshrl.u32 %v1172_v46, 16  ;;  %v1177_v57 = vshrl.u32 %v1129_v47, 16  ;;  %v1191_v58 = vpack.i.b16 %v1170_v42, %v1136_v48  ;;  %v1193_v59 = vshrl.u32 %v1136_v48, 16 }
 0x479   : > { %v1183_v60 = vpack.i.b16 %v1171_v45, %v1137_v53  ;;  %v1185_v61 = vshrl.u32 %v1137_v53, 16  ;;  %v1199_v62 = vpack.i.b16 %v1172_v46, %v1138_v54  ;;  %v1201_v63 = vshrl.u32 %v1138_v54, 16 }
 0x47a   : > { %v1179_v1 = vpack.i.b16 %v1178_v50, %v1177_v57  ;;  %v1195_v2 = vpack.i.b16 %v1194_v51, %v1193_v59  ;;  %v1205_v3 = vcombine.low %v1175_v55, %v1191_v58  ;;  %v1494_v29 = vmul.f32 %v2388_v17, %v3175_v15  ;;  %v2375_v51 = vld [vmem:[%s3392_s8] sm:$0xff]  }
 0x47b   : > { %v1187_v4 = vpack.i.b16 %v1186_v52, %v1185_v61  ;;  %v1203_v5 = vpack.i.b16 %v1202_v56, %v1201_v63  ;;  %v1213_v6 = vcombine.low %v1183_v60, %v1199_v62  ;;  %v1497_v38 = vpack.c.bf16 %v1493_v22, %v1493_v22 }
 0x47c   : > { %v1230_v7 = vcombine.low %v1179_v1, %v1195_v2  ;;  %v1212_v8 = vrot.slane %v1205_v3, %v3101_v35  ;;  %v1498_v41 = vpack.c.bf16 %v1494_v29, %v1494_v29 }
 0x47d   : > { %v1238_v9 = vcombine.low %v1187_v4, %v1203_v5  ;;  %v1220_v10 = vrot.slane %v1213_v6, %v3101_v35 }
 0x47e   : > { %v1237_v14 = vrot.slane %v1230_v7, %v3101_v35 }
 0x47f   : > { %v1221_v12 = vcombine.low %v1212_v8, %v1220_v10  ;;  %v1245_v16 = vrot.slane %v1238_v9, %v3101_v35 }
 0x481   : > { %v1228_v18 = vrot.slane %v1221_v12, %v3105_v39  ;;  %v1246_v19 = vcombine.low %v1237_v14, %v1245_v16 }
 0x483   : > { %v1253_v20 = vrot.slane %v1246_v19, %v3105_v39  ;;  %v1229_v21 = vcombine.high %v1228_v18, %v2691_v49  ;;  %v1258_v26 = vshrl.u32 %v1228_v18, 16 }
 0x485   : > { %v1257_v25 = vpack.i.b16 %v1253_v20, %v1228_v18  ;;  %v1259_v27 = vshrl.u32 %v1253_v20, 16  ;;  %v1254_v28 = vcombine.high %v1253_v20, %v2691_v49  ;;  %v1264_v30 = vshrl.u32 %v1229_v21, 16 }
 0x487   : > { %v1506_v31 = vsel %vm1504_vm3, %v1257_v25, 0  ;;  %v1260_v32 = vpack.i.b16 %v1259_v27, %v1258_v26  ;;  %v1263_v34 = vpack.i.b16 %v1254_v28, %v1229_v21  ;;  %v1265_v36 = vshrl.u32 %v1254_v28, 16 }
 0x488   : > { %2228 = vmatpush3.bf16.msra.mxu1 %v1506_v31 }
 0x489   : > { %v1552_v37 = vsel %vm1504_vm3, %v1260_v32, 0  ;;  %2239 = vmatprep.subr.bf16.mxu1 %v2684_v0  ;;  %v1266_v13 = vpack.i.b16 %v1265_v36, %v1264_v30  ;;  %v1598_v40 = vsel %vm1504_vm3, %v1263_v34, 0 }
 0x48a   : > { %2234 = vmatpush3.bf16.msra.mxu0 %v1552_v37 }
 0x48b   : > { %2230 = vmatmul.mubr.msk.bf16.vlgmr.msra.gmra.mrb[12].mxu1 %vm1268_vm2, %v1497_v38  ;;  %2245 = vmatprep.subr.bf16.mxu0 %v2684_v0  ;;  %v1644_v15 = vsel %vm1504_vm3, %v1266_v13, 0 }
 0x48c   : > { %2240 = vmatpush3.bf16.msra.mxu1 %v1598_v40  ;;  %2241 = vmatprep.mubr.msk.bf16.mxu1 %vm2685_vm0, %v2684_v0 }
 0x48d   : > { %2236 = vmatmul.mubr.msk.bf16.vlgmr.msra.gmra.mrb[16].mxu0 %vm1268_vm2, %v1498_v41  ;;  %2251 = vmatprep.subr.bf16.mxu1 %v2684_v0 }
 0x48e   : > { %2246 = vmatpush3.bf16.msra.mxu0 %v1644_v15  ;;  %2247 = vmatprep.mubr.msk.bf16.mxu0 %vm2685_vm0, %v2684_v0 }
 0x49f   : > { %v1485_v42 = vpop.xlane.xlu1 %1484 }
 0x4a0   : > { %2389 = vrcp.f32 %v1485_v42 }
 0x4a1   : > { %v1488_v43 = vpop.xlane.xlu0 %1487 }
 0x4a2   : > { %2391 = vrcp.f32 %v1488_v43 }
 0x4aa   : > { %v2390_v44 = vpop.eup %2389 }
 0x4ab   : > { %v1495_v45 = vmul.f32 %v2390_v44, %v3181_v23 }
 0x4ac   : > { %v2392_v46 = vpop.eup %2391 }
 0x4ad   : > { %v1496_v47 = vmul.f32 %v2392_v46, %v3183_v24  ;;  %v1499_v48 = vpack.c.bf16 %v1495_v45, %v1495_v45 }
 0x4af   : > { %2242 = vmatmul.mubr.msk.bf16.vlgmr.msra.gmra.mrb[16].mxu1 %vm1268_vm2, %v1499_v48  ;;  %v1500_v50 = vpack.c.bf16 %v1496_v47, %v1496_v47 }
 0x4b0   : > { %2255 = vmatprep.mubr.msk.bf16.mxu1 %vm2685_vm0, %v2684_v0  ;;  %2252 = vmatpush3.bf16.msra.mxu1 %v2375_v51 }
 0x4b1   : > { %2248 = vmatmul.mubr.msk.bf16.vlgmr.msra.gmra.mrb[20].mxu0 %vm1268_vm2, %v1500_v50  ;;  %2253 = vmatprep.subr.bf16.mxu1 %v2684_v0 }
 0x55e   : > { %v1542_v23 = vpop.f32.mrb[12].mxu1 }
 0x55f   : > { %v2231_v52 = vpop.f32.mrb[13].mxu1  ;;  %v1689_v58 = vsel %vm1688_vm4, 0.0, %v1542_v23 }
 0x560   : > { %v1545_v53 = vpop.f32.mrb[14].mxu1  ;;  %v1588_v24 = vpop.f32.mrb[16].mxu0  ;;  %v1693_v60 = vpack.c.bf16 %v1689_v58, %v1689_v58  ;;  %v2376_v52 = vld [vmem:[%s3392_s8 + $0x8] sm:$0xff]  }
 0x561   : > { %v2232_v54 = vpop.f32.mrb[15].mxu1  ;;  %v2237_v55 = vpop.f32.mrb[17].mxu0  ;;  %v1690_v59 = vsel %vm1688_vm4, 0.0, %v1588_v24  ;;  %2254 = vmatpush3.bf16.msra.mxu1 %v2376_v52 }
 0x562   : > { %v1591_v56 = vpop.f32.mrb[18].mxu0  ;;  %v1727_v1 = vpack.c.bf16 %v1690_v59, %v1690_v59  ;;  %v1700_v7 = vrot.slane %v1693_v60, %v3101_v35 }
 0x563   : > { %v2238_v57 = vpop.f32.mrb[19].mxu0 }
 0x564   : > { %v1734_v11 = vrot.slane %v1727_v1, %v3101_v35 }
 0x582   : > { %v1634_v61 = vpop.f32.mrb[16].mxu1 }
 0x583   : > { %v1691_v62 = vsel %vm1688_vm4, 0.0, %v1634_v61  ;;  %v2243_v63 = vpop.f32.mrb[17].mxu1 }
 0x584   : > { %v1701_v2 = vpack.c.bf16 %v1691_v62, %v1691_v62  ;;  %v1637_v3 = vpop.f32.mrb[18].mxu1  ;;  %v1680_v0 = vpop.f32.mrb[20].mxu0 }
 0x585   : > { %v1692_v4 = vsel %vm1688_vm4, 0.0, %v1680_v0  ;;  %v2244_v5 = vpop.f32.mrb[19].mxu1  ;;  %v2249_v6 = vpop.f32.mrb[21].mxu0 }
 0x586   : > { %v1708_v8 = vrot.slane %v1701_v2, %v3101_v35  ;;  %v1735_v9 = vpack.c.bf16 %v1692_v4, %v1692_v4  ;;  %v1683_v10 = vpop.f32.mrb[22].mxu0 }
 0x587   : > { %v2250_v33 = vpop.f32.mrb[23].mxu0 }
 0x588   : > { %v1709_v12 = vcombine.low %v1700_v7, %v1708_v8  ;;  %v1710_v14 = vcombine.high %v1700_v7, %v1708_v8  ;;  %v1742_v16 = vrot.slane %v1735_v9, %v3101_v35  ;;  %v2143_v7 = vld [vmem:[%s3393_s13] ss:$0 sm:$0xff] }
 0x58a   : > { %v1717_v17 = vrot.slane %v1709_v12, %v3105_v39  ;;  %v1724_v18 = vrot.slane %v1710_v14, %v3105_v39  ;;  %v1743_v19 = vcombine.low %v1734_v11, %v1742_v16  ;;  %v1744_v20 = vcombine.high %v1734_v11, %v1742_v16 }
 0x58c   : > { %v1725_v21 = vcombine.high %v1717_v17, %v2691_v49  ;;  %v1751_v22 = vrot.slane %v1743_v19, %v3105_v39  ;;  %v1758_v25 = vrot.slane %v1744_v20, %v3105_v39  ;;  %v1726_v26 = vcombine.high %v1724_v18, %v2691_v49 }
 0x58d   : > { %v1765_v27 = vshrl.u32 %v1717_v17, 16  ;;  %v1781_v34 = vshrl.u32 %v1724_v18, 16 }
 0x58e   : > { %v1759_v28 = vcombine.high %v1751_v22, %v2691_v49  ;;  %v1760_v29 = vcombine.high %v1758_v25, %v2691_v49  ;;  %v1763_v30 = vpack.i.b16 %v1751_v22, %v1717_v17  ;;  %v1766_v31 = vshrl.u32 %v1751_v22, 16 }
 0x58f   : > { %v1773_v32 = vshrl.u32 %v1725_v21, 16  ;;  %v1779_v36 = vpack.i.b16 %v1758_v25, %v1724_v18  ;;  %v1782_v37 = vshrl.u32 %v1758_v25, 16  ;;  %v1789_v15 = vshrl.u32 %v1726_v26, 16 }
 0x590   : > { %v1767_v38 = vpack.i.b16 %v1766_v31, %v1765_v27  ;;  %v1771_v13 = vpack.i.b16 %v1759_v28, %v1725_v21  ;;  %v1774_v40 = vshrl.u32 %v1759_v28, 16  ;;  %v1787_v41 = vpack.i.b16 %v1760_v29, %v1726_v26 }
 0x591   : > { %v1783_v42 = vpack.i.b16 %v1782_v37, %v1781_v34  ;;  %v1790_v43 = vshrl.u32 %v1760_v29, 16  ;;  %v1793_v44 = vcombine.low %v1763_v30, %v1779_v36 }
 0x592   : > { %v1775_v45 = vpack.i.b16 %v1774_v40, %v1773_v32  ;;  %v1801_v46 = vcombine.low %v1771_v13, %v1787_v41 }
 0x593   : > { %v1791_v47 = vpack.i.b16 %v1790_v43, %v1789_v15  ;;  %v1818_v48 = vcombine.low %v1767_v38, %v1783_v42  ;;  %v1800_v50 = vrot.slane %v1793_v44, %v3101_v35 }
 0x594   : > { %v1808_v51 = vrot.slane %v1801_v46, %v3101_v35 }
 0x595   : > { %v1826_v23 = vcombine.low %v1775_v45, %v1791_v47  ;;  %v1825_v24 = vrot.slane %v1818_v48, %v3101_v35 }
 0x596   : > { %v1809_v53 = vcombine.low %v1800_v50, %v1808_v51 }
 0x597   : > { %v1833_v54 = vrot.slane %v1826_v23, %v3101_v35 }
 0x598   : > { %v1816_v55 = vrot.slane %v1809_v53, %v3105_v39 }
 0x599   : > { %v1834_v56 = vcombine.low %v1825_v24, %v1833_v54 }
 0x59a   : > { %v1817_v58 = vcombine.high %v1816_v55, %v2691_v49  ;;  %v1846_v59 = vshrl.u32 %v1816_v55, 16 }
 0x59b   : > { %v1841_v57 = vrot.slane %v1834_v56, %v3105_v39 }
 0x59c   : > { %v1852_v2 = vshrl.u32 %v1817_v58, 16 }
 0x59d   : > { %v1847_v60 = vshrl.u32 %v1841_v57, 16  ;;  %v1842_v61 = vcombine.high %v1841_v57, %v2691_v49  ;;  %v1845_v62 = vpack.i.b16 %v1841_v57, %v1816_v55 }
 0x59f   : > { %v1848_v63 = vpack.i.b16 %v1847_v60, %v1846_v59  ;;  %v1851_v1 = vpack.i.b16 %v1842_v61, %v1817_v58  ;;  %v1853_v3 = vshrl.u32 %v1842_v61, 16 }
 0x5a1   : > { %1855 = vrot.lane.b32.xlu0 %v1848_v63, %s2692_s28  ;;  %1857 = vrot.lane.b32.xlu1 %v1851_v1, %s2693_s14  ;;  %v1854_v35 = vpack.i.b16 %v1853_v3, %v1852_v2 }
 0x5a5   : > { %1859 = vrot.lane.b32.xlu1 %v1854_v35, %s2694_s7 }
 0x613   : > { %v1856_v39 = vpop.permute.xlu0 %1855  ;;  %v1858_v0 = vpop.permute.xlu1 %1857 }
 0x614   : > { %v1863_v4 = vsel %vm1268_vm2, %v1845_v62, %v1856_v39 }
 0x615   : > { %v1866_v49 = vsel %vm1864_vm5, %v1863_v4, %v1858_v0 }
 0x617   : > { %v1860_v5 = vpop.permute.xlu1 %1859 }
 0x618   : > { %v1869_v6 = vsel %vm1867_vm6, %v1866_v49, %v1860_v5 }
 0x619   : > { %2256 = vmatmul.mubr.msk.bf16.vlgmr.msra.gmra.mrb[20].mxu1 %vm580_vm1, %v1869_v6 }
 0x6ec   : > { %v1929_v8 = vpop.f32.mrb[20].mxu1 }
 0x6ed   : > { %v1930_v9 = vadd.f32 %v2143_v7, %v1929_v8  ;;  %v2257_v10 = vpop.f32.mrb[21].mxu1 }
 0x6ee   : > { %v1932_v33 = vpop.f32.mrb[22].mxu1 }
 0x6ef   : > { %v2258_v11 = vpop.f32.mrb[23].mxu1  ;;  %1935 = vst.msk [vmem:[%s553_s17] sm:$0xff] %vm580_vm1, %v1930_v9 }
 0x6f0   : > { %2608 = shalt.err (!%p2605_p13)
}
 0x6f1   : > { %s2609_s3 = scalar_lea.hbm %s3268_s20, 128  ;;  %s2613_s28 = scalar_lea.hbm %s3396_s15, 256 }
 0x6f2   : > { %p2610_p3 = scmp.ne.s32.totalorder %s3268_s20, %s2609_s3  ;;  %p2614_p9 = scmp.lt.u32.totalorder %s3268_s20, %s3396_s15 }
 0x6f3   : > { %p2615_p1 = scmp.lt.u32.totalorder %s2613_s28, %s2609_s3  ;;  %p2617_p12 = scmp.lt.u32.totalorder %s2609_s3, %s3268_s20 }
 0x6f4   : > { %p2611_p6 = pnand %p2610_p3, %p3397_p4 }
 0x6f5   : > { %p2616_p10 = por %p2615_p1, %p2614_p9 }
 0x6f6   : > { %p2612_p11 = pneg %p2611_p6 }
 0x6f7   : > { %p2618_p7 = por %p2617_p12, %p2616_p10 }
 0x6f9   : > { %p2619_p2 = pnand %p2618_p7, %p2612_p11 }
 0x6fb   : > { %2622 = shalt.err (!%p2619_p2)
}
 0x6fc   : > { %2281 = dma.vmem_to_hbm [thread:$0]  (%p3397_p4), %s3270_s30, 128, %s3268_s20, %s1937_s27  }
 0x6fd PF: > { %s3398_s26 = sld [smem:[#allocation20_spill]]  ;;  %s3399_s29 = sld [smem:[#allocation25_spill]] }
 0x6fe   : > { %s3400_s13 = sld [smem:[#allocation21_spill]] }
 0x703   : > { %s1962_s18 = sand.u32 1, %s3398_s26   ;;  %p3401_p8 = scmp.ne.s32.totalorder %s3399_s29, 0 }
 0x704   : > { %p3402_p5 = scmp.ge.s32.totalorder %s3400_s13, 2  ;;  %s1963_s17 = scalar_lea.sflag [#allocation4], %s1962_s18 }
 0x706   : > { %p2307_p0 = pnand %p3402_p5, %p3401_p8 }
 0x708   : > { %2656 = dma.done.wait (!%p2307_p0), %s1963_s17, 128  }
 0x709   : > { %2658 = vsyncadd (!%p2307_p0), %s1963_s17, 4294967168  ;;  %s3403_s24 = sld [smem:[#allocation22_spill]]  ;;  %s3404_s11 = sld [smem:[#allocation23_spill]] }
 0x70a   : > { %s3405_s21 = smov %s2665_s22  ;;  %s3406_s22 = smov %s2669_s23 }
 0x70f   : > { %p30_p13 = scmp.ge.s32.totalorder %s3403_s24, 4   ;;  %s3407_s23 = smov %s3404_s11 }
 0x711   :  { %32 = sbr.rel (!%p30_p13) target bundleno = 18 (0x12), region = 153 }
 0x718   :  { %1968 = vsyncpa [#allocation3], 1 }
 0x719   :  { %1970 = vsyncpa [#allocation3 + $0x1], 1 }
 0x71a   :  { %1971 = vsyncpa [#allocation6], 1 }
 0x71b   :  { %1973 = vsyncpa [#allocation6 + $0x1], 1 }
 0x71c   :  { %1974 = vsyncpa [#allocation9], 1 }
 0x71d   :  { %1975 = vsyncpa [#allocation12], 1 }
 0x71e   :  { %1976 = vsyncpa [#allocation4], 1 }
 0x71f   :  { %1978 = vsyncpa [#allocation4 + $0x1], 1 }

</bundles_post_ra>
